<compile_context>
chip_gen: v7x
topology: tpu7x:2x2x1
jax: 0.10.0
libtpu: 0.0.40
codegen_flags: <defaults>
</compile_context>

<pallas_src>
import functools

import jax
import jax.numpy as jnp
from jax.experimental import pallas as pl
from jax.experimental.pallas import tpu as pltpu


def _round_up(x, m):
    return (x + m - 1) // m * m


# ----------------------------------------------------------------------------
# Fusion kernel: reflection-padded 3x3 conv + bias + LeakyReLU(0.2)
# ----------------------------------------------------------------------------
def _fusion_conv_kernel(x_ref, w_ref, b_ref, o_ref, stk_ref, *, tile_h, wp, cin):
    """One (batch, row-tile) grid step.

    x_ref  : (1, 1, Cin, Lt) reflection-padded rows for this tile (bf16),
             rows stored with padded stride wp, +2 tail elements for the
             bottom-right tap, zero-padded up to Lt.
    w_ref  : (Co, 9*Cin)     fused per-tap weights (bf16)
    b_ref  : (Co, 1)         bias (f32)
    o_ref  : (1, 1, Co, L)   output rows at stride wp (bf16)
    stk_ref: (9*Cin, L)      stacked shifted-window scratch (bf16)
    """
    L = tile_h * wp

    # Build the stacked-window matrix: tap (dy,dx) is a static shifted slice of
    # the flattened padded rows; 9 stores, every row of the scratch is written
    # each step (no stale/uninitialized data).
    for dy in range(3):
        for dx in range(3):
            t = dy * 3 + dx
            s = dy * wp + dx                              # static shift
            stk_ref[t * cin:(t + 1) * cin, :] = x_ref[0, 0, :, s:s + L]

    # One MXU dispatch, K = 9*Cin, f32 accumulation.
    acc = jnp.dot(w_ref[...], stk_ref[...],
                  preferred_element_type=jnp.float32)     # (Co, L)
    y = acc + b_ref[...]                                  # (Co, L) + (Co, 1)
    y = jnp.where(y > 0.0, y, 0.2 * y)                    # LeakyReLU(0.2)
    o_ref[0, 0] = y.astype(o_ref.dtype)


def _vmem_limit_bytes():
    """Generation-aware VMEM limit (v7x has only 64 MiB physical per core)."""
    cap = 64 << 20                                        # conservative default
    try:
        info = pltpu.get_tpu_info()
        cap = int(getattr(info, "vmem_capacity_bytes", cap) or cap)
    except Exception:
        pass
    return max(32 << 20, min(cap // 2, 64 << 20))


def _plan_row_tiles(N, H, W, cin, cout, budget_bytes):
    """Largest row tile (divisor of H) whose double-buffered footprint fits the
    budget, preferring N*n_rt >= 2 (megacore occupancy) and <= 8 MiB/input."""
    wp = W + 2
    cands = []
    for th in range(1, H + 1):
        if H % th:
            continue
        n_rt = H // th
        L = th * wp
        Lt = _round_up((th + 2) * wp + 2, 128)
        in_bytes = cin * Lt * 2
        vmem = (2 * in_bytes                      # double-buffered bf16 input
                + 2 * cout * L * 2                # double-buffered bf16 output
                + 9 * cin * L * 2                 # stacked-window scratch
                + 2 * (cout * 9 * cin * 2 + cout * 4))   # weights + bias
        if vmem > budget_bytes:
            continue
        occ = (N * n_rt) >= 2
        small = in_bytes <= (8 << 20)
        cands.append(((occ, small, th), th, n_rt))
    if not cands:
        return 1, H
    cands.sort()
    _, th, n_rt = cands[-1]
    return th, n_rt


def _fusion_conv(cat, fusion_w, fusion_b):
    """ReflectionPad2d(1) + Conv2d 3x3 + bias + LeakyReLU(0.2), NCHW."""
    N, Cin, H, W = cat.shape
    Co = fusion_w.shape[0]
    wp = W + 2
    K = 9 * Cin

    vmem_limit = _vmem_limit_bytes()
    tile_h, n_rt = _plan_row_tiles(N, H, W, Cin, Co, (vmem_limit * 3) // 4)
    L = tile_h * wp
    Lt = _round_up((tile_h + 2) * wp + 2, 128)

    # --- single prep pass: column reflection + overlapped row tiles + bf16 ---
    cols = jnp.concatenate([jnp.array([1], jnp.int32),
                            jnp.arange(W, dtype=jnp.int32),
                            jnp.array([W - 2], jnp.int32)])           # (wp,)
    rows = (jnp.arange(n_rt, dtype=jnp.int32)[:, None] * tile_h
            + jnp.arange(tile_h + 2, dtype=jnp.int32)[None, :] - 1)   # (n_rt, th+2)
    rows = jnp.where(rows < 0, -rows,
                     jnp.where(rows >= H, 2 * (H - 1) - rows, rows))

    xg = cat.astype(jnp.bfloat16)
    xg = jnp.take(xg, cols, axis=3)                       # (N, Cin, H, wp)
    xg = jnp.take(xg, rows.reshape(-1), axis=2)           # (N, Cin, n_rt*(th+2), wp)
    xg = xg.reshape(N, Cin, n_rt, tile_h + 2, wp)
    xg = jnp.transpose(xg, (0, 2, 1, 3, 4))
    xg = xg.reshape(N, n_rt, Cin, (tile_h + 2) * wp)
    xg = jnp.pad(xg, ((0, 0), (0, 0), (0, 0), (0, Lt - (tile_h + 2) * wp)))

    # PyTorch (Co, Cin, 3, 3) -> (Co, 9*Cin), column block t=dy*3+dx holds w[:,:,dy,dx].
    w9 = jnp.transpose(fusion_w, (0, 2, 3, 1)).reshape(Co, K).astype(jnp.bfloat16)
    b2 = fusion_b.reshape(Co, 1).astype(jnp.float32)

    kernel = functools.partial(_fusion_conv_kernel, tile_h=tile_h, wp=wp, cin=Cin)
    out = pl.pallas_call(
        kernel,
        out_shape=jax.ShapeDtypeStruct((N, n_rt, Co, L), jnp.bfloat16),
        grid_spec=pltpu.PrefetchScalarGridSpec(
            num_scalar_prefetch=0,
            grid=(N, n_rt),
            in_specs=[
                pl.BlockSpec((1, 1, Cin, Lt), lambda n, r: (n, r, 0, 0)),  # rows
                pl.BlockSpec((Co, K), lambda n, r: (0, 0)),                # weights
                pl.BlockSpec((Co, 1), lambda n, r: (0, 0)),                # bias
            ],
            out_specs=pl.BlockSpec((1, 1, Co, L), lambda n, r: (n, r, 0, 0)),
            scratch_shapes=[pltpu.VMEM((K, L), jnp.bfloat16)],
        ),
        compiler_params=pltpu.CompilerParams(
            dimension_semantics=("parallel", "parallel"),   # megacore-shardable
            vmem_limit_bytes=vmem_limit,
        ),
    )(xg, w9, b2)

    # Strip padded columns; fused with transpose + f32 cast in one XLA pass.
    out = out.reshape(N, n_rt, Co, tile_h, wp)
    out = jnp.transpose(out, (0, 2, 1, 3, 4)).reshape(N, Co, H, wp)
    return out[:, :, :, :W].astype(jnp.float32)


# ----------------------------------------------------------------------------
# Plain-JAX glue for the tiny per-level branch (per perf review)
# ----------------------------------------------------------------------------
def _source_index(out_size, in_size):
    # PyTorch bilinear, align_corners=False semantics.
    scale = in_size / out_size
    i = jnp.arange(out_size, dtype=jnp.float32)
    src = jnp.maximum((i + 0.5) * scale - 0.5, 0.0)
    i0 = jnp.clip(jnp.floor(src).astype(jnp.int32), 0, in_size - 1)
    i1 = jnp.minimum(i0 + 1, in_size - 1)
    lam = src - i0.astype(jnp.float32)
    return i0, i1, lam


def _bilinear_upsample_nchw(x, H, W):
    n, c, h, w = x.shape
    if (h, w) == (H, W):
        return x
    h0, h1, lh = _source_index(H, h)
    w0, w1, lw = _source_index(W, w)
    rows = (x[:, :, h0, :] * (1.0 - lh)[None, None, :, None]
            + x[:, :, h1, :] * lh[None, None, :, None])
    return rows[:, :, :, w0] * (1.0 - lw) + rows[:, :, :, w1] * lw


# ----------------------------------------------------------------------------
# SPP forward (NCHW -> NCHW)
# ----------------------------------------------------------------------------
def spp_forward(x, params, num_layers=4):
    N, C, H, W = x.shape
    kmax = 2 * 2 ** num_layers
    # TODO(synk): F.avg_pool2d(stride=kernel) floors odd remainders; spatial
    # sizes that are not multiples of kmax would need a masked pooling path.
    assert H % kmax == 0 and W % kmax == 0, (
        f"H, W must be multiples of {kmax} (got {H}x{W})")

    # Per-level branch: avg-pool -> 1x1 conv (+LeakyReLU) -> bilinear upsample.
    # Tiny vs the fusion stage, so it stays in plain JAX (fuses in XLA) instead
    # of 4 overhead-only grid=(1,) pallas_calls.  Branch outputs are cast to
    # bf16 so the concat + tile-prep passes move half the bytes.
    outs = []
    for level in range(num_layers):
        k = 2 * 2 ** (level + 1)                       # 4, 8, 16, 32
        pooled = x.reshape(N, C, H // k, k, W // k, k).mean(axis=(3, 5))
        w = params['pw_w'][level][:, :, 0, 0]          # PyTorch (Co, Ci, 1, 1)
        b = params['pw_b'][level]
        y = jnp.einsum('oc,nchw->nohw', w, pooled) + b[None, :, None, None]
        y = jnp.where(y > 0.0, y, 0.2 * y)             # LeakyReLU(0.2)
        outs.append(_bilinear_upsample_nchw(y, H, W).astype(jnp.bfloat16))
    outs.append(x.astype(jnp.bfloat16))
    cat = jnp.concatenate(outs, axis=1)                # (N, 5*C, H, W) bf16

    # Fusion: ReflectionPad2d(1) + 3x3 conv + bias + LeakyReLU(0.2) -- Pallas.
    return _fusion_conv(cat, params['fusion_w'], params['fusion_b'])


# ----------------------------------------------------------------------------
# Deterministic parameter init (PyTorch Conv2d layouts)
# ----------------------------------------------------------------------------
def init_params(key, in_ch, out_ch, num_layers=4):
    keys = jax.random.split(key, 2 * num_layers + 2)
    pw_w, pw_b = [], []
    for l in range(num_layers):
        pw_w.append(0.1 * jax.random.normal(keys[2 * l], (in_ch, in_ch, 1, 1),
                                            jnp.float32))
        pw_b.append(0.1 * jax.random.normal(keys[2 * l + 1], (in_ch,),
                                            jnp.float32))
    cin5 = in_ch * (num_layers + 1)
    fusion_w = 0.05 * jax.random.normal(keys[-2], (out_ch, cin5, 3, 3),
                                        jnp.float32)
    fusion_b = 0.05 * jax.random.normal(keys[-1], (out_ch,), jnp.float32)
    return dict(pw_w=pw_w, pw_b=pw_b, fusion_w=fusion_w, fusion_b=fusion_b)


if __name__ == "__main__":
    key = jax.random.PRNGKey(0)
    kx, kp = jax.random.split(key)

    # Spatial size must be a multiple of 32 (level-3 avg-pool kernel).
    N, C, H, W = 2, 4, 32, 32
    C_OUT = 8

    x = jax.random.normal(kx, (N, C, H, W), jnp.float32)
    params = init_params(kp, C, C_OUT, num_layers=4)

    fwd = jax.jit(functools.partial(spp_forward, num_layers=4))
    out = jax.block_until_ready(fwd(x, params))
    assert out.shape == (N, C_OUT, H, W), out.shape
    assert bool(jnp.all(jnp.isfinite(out)))
    print("KERNEL_OK")
</pallas_src>

<mosaic_0001>
module attributes {stable_mosaic.version = 11 : i64} {
  func.func @_fusion_conv_kernel(%arg0: i32, %arg1: i32, %arg2: memref<1x1x20x1280xbf16, #tpu.memory_space<vmem>>, %arg3: memref<8x180xbf16, #tpu.memory_space<vmem>>, %arg4: memref<8x1xf32, #tpu.memory_space<vmem>>, %arg5: memref<1x1x8x1088xbf16, #tpu.memory_space<vmem>>, %arg6: memref<180x1088xbf16, #tpu.memory_space<vmem>>) attributes {dimension_semantics = [#tpu.dimension_semantics<parallel>, #tpu.dimension_semantics<parallel>], iteration_bounds = array<i64: 2, 1>, scalar_prefetch = 0 : i64, scratch_operands = 1 : i64, tpu.core_type = #tpu.core_type<tc>, window_params = [{transform_indices = @transform_0, window_bounds = array<i64: 1, 1, 20, 1280>}, {pipeline_mode = #tpu.pipeline_mode<synchronous>, transform_indices = @transform_1, window_bounds = array<i64: 8, 180>}, {pipeline_mode = #tpu.pipeline_mode<synchronous>, transform_indices = @transform_2, window_bounds = array<i64: 8, 1>}, {transform_indices = @transform_3, window_bounds = array<i64: 1, 1, 8, 1088>}]} {
    %c0 = arith.constant 0 : index
    %c0_0 = arith.constant 0 : index
    %c0_1 = arith.constant 0 : index
    %c0_2 = arith.constant 0 : index
    %0 = vector.load %arg2[%c0, %c0_0, %c0_1, %c0_2] : memref<1x1x20x1280xbf16, #tpu.memory_space<vmem>>, vector<1x1x20x1088xbf16>
    %1 = vector.shape_cast %0 : vector<1x1x20x1088xbf16> to vector<20x1088xbf16>
    %c0_3 = arith.constant 0 : index
    %c0_4 = arith.constant 0 : index
    %2 = vector.load %arg6[%c0_3, %c0_4] : memref<180x1088xbf16, #tpu.memory_space<vmem>>, vector<20x1088xbf16>
    tpu.vector_store %arg6[%c0_3, %c0_4], %1 {strides = array<i32>} : memref<180x1088xbf16, #tpu.memory_space<vmem>>, vector<20x1088xbf16>,
    %c0_5 = arith.constant 0 : index
    %c0_6 = arith.constant 0 : index
    %c0_7 = arith.constant 0 : index
    %c1 = arith.constant 1 : index
    %3 = vector.load %arg2[%c0_5, %c0_6, %c0_7, %c1] : memref<1x1x20x1280xbf16, #tpu.memory_space<vmem>>, vector<1x1x20x1088xbf16>
    %4 = vector.shape_cast %3 : vector<1x1x20x1088xbf16> to vector<20x1088xbf16>
    %c20 = arith.constant 20 : index
    %c0_8 = arith.constant 0 : index
    %5 = vector.load %arg6[%c20, %c0_8] : memref<180x1088xbf16, #tpu.memory_space<vmem>>, vector<20x1088xbf16>
    tpu.vector_store %arg6[%c20, %c0_8], %4 {strides = array<i32>} : memref<180x1088xbf16, #tpu.memory_space<vmem>>, vector<20x1088xbf16>,
    %c0_9 = arith.constant 0 : index
    %c0_10 = arith.constant 0 : index
    %c0_11 = arith.constant 0 : index
    %c2 = arith.constant 2 : index
    %6 = vector.load %arg2[%c0_9, %c0_10, %c0_11, %c2] : memref<1x1x20x1280xbf16, #tpu.memory_space<vmem>>, vector<1x1x20x1088xbf16>
    %7 = vector.shape_cast %6 : vector<1x1x20x1088xbf16> to vector<20x1088xbf16>
    %c40 = arith.constant 40 : index
    %c0_12 = arith.constant 0 : index
    %8 = vector.load %arg6[%c40, %c0_12] : memref<180x1088xbf16, #tpu.memory_space<vmem>>, vector<20x1088xbf16>
    tpu.vector_store %arg6[%c40, %c0_12], %7 {strides = array<i32>} : memref<180x1088xbf16, #tpu.memory_space<vmem>>, vector<20x1088xbf16>,
    %c0_13 = arith.constant 0 : index
    %c0_14 = arith.constant 0 : index
    %c0_15 = arith.constant 0 : index
    %c34 = arith.constant 34 : index
    %9 = vector.load %arg2[%c0_13, %c0_14, %c0_15, %c34] : memref<1x1x20x1280xbf16, #tpu.memory_space<vmem>>, vector<1x1x20x1088xbf16>
    %10 = vector.shape_cast %9 : vector<1x1x20x1088xbf16> to vector<20x1088xbf16>
    %c60 = arith.constant 60 : index
    %c0_16 = arith.constant 0 : index
    %11 = vector.load %arg6[%c60, %c0_16] : memref<180x1088xbf16, #tpu.memory_space<vmem>>, vector<20x1088xbf16>
    tpu.vector_store %arg6[%c60, %c0_16], %10 {strides = array<i32>} : memref<180x1088xbf16, #tpu.memory_space<vmem>>, vector<20x1088xbf16>,
    %c0_17 = arith.constant 0 : index
    %c0_18 = arith.constant 0 : index
    %c0_19 = arith.constant 0 : index
    %c35 = arith.constant 35 : index
    %12 = vector.load %arg2[%c0_17, %c0_18, %c0_19, %c35] : memref<1x1x20x1280xbf16, #tpu.memory_space<vmem>>, vector<1x1x20x1088xbf16>
    %13 = vector.shape_cast %12 : vector<1x1x20x1088xbf16> to vector<20x1088xbf16>
    %c80 = arith.constant 80 : index
    %c0_20 = arith.constant 0 : index
    %14 = vector.load %arg6[%c80, %c0_20] : memref<180x1088xbf16, #tpu.memory_space<vmem>>, vector<20x1088xbf16>
    tpu.vector_store %arg6[%c80, %c0_20], %13 {strides = array<i32>} : memref<180x1088xbf16, #tpu.memory_space<vmem>>, vector<20x1088xbf16>,
    %c0_21 = arith.constant 0 : index
    %c0_22 = arith.constant 0 : index
    %c0_23 = arith.constant 0 : index
    %c36 = arith.constant 36 : index
    %15 = vector.load %arg2[%c0_21, %c0_22, %c0_23, %c36] : memref<1x1x20x1280xbf16, #tpu.memory_space<vmem>>, vector<1x1x20x1088xbf16>
    %16 = vector.shape_cast %15 : vector<1x1x20x1088xbf16> to vector<20x1088xbf16>
    %c100 = arith.constant 100 : index
    %c0_24 = arith.constant 0 : index
    %17 = vector.load %arg6[%c100, %c0_24] : memref<180x1088xbf16, #tpu.memory_space<vmem>>, vector<20x1088xbf16>
    tpu.vector_store %arg6[%c100, %c0_24], %16 {strides = array<i32>} : memref<180x1088xbf16, #tpu.memory_space<vmem>>, vector<20x1088xbf16>,
    %c0_25 = arith.constant 0 : index
    %c0_26 = arith.constant 0 : index
    %c0_27 = arith.constant 0 : index
    %c68 = arith.constant 68 : index
    %18 = vector.load %arg2[%c0_25, %c0_26, %c0_27, %c68] : memref<1x1x20x1280xbf16, #tpu.memory_space<vmem>>, vector<1x1x20x1088xbf16>
    %19 = vector.shape_cast %18 : vector<1x1x20x1088xbf16> to vector<20x1088xbf16>
    %c120 = arith.constant 120 : index
    %c0_28 = arith.constant 0 : index
    %20 = vector.load %arg6[%c120, %c0_28] : memref<180x1088xbf16, #tpu.memory_space<vmem>>, vector<20x1088xbf16>
    tpu.vector_store %arg6[%c120, %c0_28], %19 {strides = array<i32>} : memref<180x1088xbf16, #tpu.memory_space<vmem>>, vector<20x1088xbf16>,
    %c0_29 = arith.constant 0 : index
    %c0_30 = arith.constant 0 : index
    %c0_31 = arith.constant 0 : index
    %c69 = arith.constant 69 : index
    %21 = vector.load %arg2[%c0_29, %c0_30, %c0_31, %c69] : memref<1x1x20x1280xbf16, #tpu.memory_space<vmem>>, vector<1x1x20x1088xbf16>
    %22 = vector.shape_cast %21 : vector<1x1x20x1088xbf16> to vector<20x1088xbf16>
    %c140 = arith.constant 140 : index
    %c0_32 = arith.constant 0 : index
    %23 = vector.load %arg6[%c140, %c0_32] : memref<180x1088xbf16, #tpu.memory_space<vmem>>, vector<20x1088xbf16>
    tpu.vector_store %arg6[%c140, %c0_32], %22 {strides = array<i32>} : memref<180x1088xbf16, #tpu.memory_space<vmem>>, vector<20x1088xbf16>,
    %c0_33 = arith.constant 0 : index
    %c0_34 = arith.constant 0 : index
    %c0_35 = arith.constant 0 : index
    %c70 = arith.constant 70 : index
    %24 = vector.load %arg2[%c0_33, %c0_34, %c0_35, %c70] : memref<1x1x20x1280xbf16, #tpu.memory_space<vmem>>, vector<1x1x20x1088xbf16>
    %25 = vector.shape_cast %24 : vector<1x1x20x1088xbf16> to vector<20x1088xbf16>
    %c160 = arith.constant 160 : index
    %c0_36 = arith.constant 0 : index
    %26 = vector.load %arg6[%c160, %c0_36] : memref<180x1088xbf16, #tpu.memory_space<vmem>>, vector<20x1088xbf16>
    tpu.vector_store %arg6[%c160, %c0_36], %25 {strides = array<i32>} : memref<180x1088xbf16, #tpu.memory_space<vmem>>, vector<20x1088xbf16>,
    %c0_37 = arith.constant 0 : index
    %c0_38 = arith.constant 0 : index
    %27 = vector.load %arg3[%c0_37, %c0_38] : memref<8x180xbf16, #tpu.memory_space<vmem>>, vector<8x180xbf16>
    %c0_39 = arith.constant 0 : index
    %c0_40 = arith.constant 0 : index
    %28 = vector.load %arg6[%c0_39, %c0_40] : memref<180x1088xbf16, #tpu.memory_space<vmem>>, vector<180x1088xbf16>
    %cst = arith.constant dense<0.000000e+00> : vector<8x1088xf32>
    %29 = tpu.matmul %27, %28, %cst {dimension_numbers = #tpu.dot_dimension_numbers<[1], [0], [0], [1], [0, 0, 1, 1], [], []>} : vector<8x180xbf16>, vector<180x1088xbf16>, vector<8x1088xf32> -> vector<8x1088xf32>
    %c0_41 = arith.constant 0 : index
    %c0_42 = arith.constant 0 : index
    %30 = vector.load %arg4[%c0_41, %c0_42] : memref<8x1xf32, #tpu.memory_space<vmem>>, vector<8x1xf32>
    %31 = vector.broadcast %30 : vector<8x1xf32> to vector<8x1088xf32>
    %32 = arith.addf %29, %31 : vector<8x1088xf32>
    %cst_43 = arith.constant 0.000000e+00 : f32
    %33 = vector.broadcast %cst_43 : f32 to vector<8x1088xf32>
    %34 = arith.cmpf ogt, %32, %33 : vector<8x1088xf32>
    %cst_44 = arith.constant 2.000000e-01 : f32
    %35 = vector.broadcast %cst_44 : f32 to vector<8x1088xf32>
    %36 = arith.mulf %35, %32 : vector<8x1088xf32>
    %37 = arith.select %34, %32, %36 : vector<8x1088xi1>, vector<8x1088xf32>
    %38 = arith.truncf %37 : vector<8x1088xf32> to vector<8x1088xbf16>
    %c0_45 = arith.constant 0 : index
    %c0_46 = arith.constant 0 : index
    %c0_47 = arith.constant 0 : index
    %c0_48 = arith.constant 0 : index
    %39 = vector.load %arg5[%c0_45, %c0_46, %c0_47, %c0_48] : memref<1x1x8x1088xbf16, #tpu.memory_space<vmem>>, vector<1x1x8x1088xbf16>
    %40 = vector.shape_cast %39 : vector<1x1x8x1088xbf16> to vector<8x1088xbf16>
    %41 = vector.shape_cast %38 : vector<8x1088xbf16> to vector<1x1x8x1088xbf16>
    tpu.vector_store %arg5[%c0_45, %c0_46, %c0_47, %c0_48], %41 {strides = array<i32>} : memref<1x1x8x1088xbf16, #tpu.memory_space<vmem>>, vector<1x1x8x1088xbf16>,
    return
  }
  func.func @transform_0(%arg0: i32, %arg1: i32) -> (i32, i32, i32, i32) {
    %c0_i32 = arith.constant 0 : i32
    %c0_i32_0 = arith.constant 0 : i32
    %c0_i32_1 = arith.constant 0 : i32
    return %arg0, %arg1, %c0_i32, %c0_i32_0 : i32, i32, i32, i32
  }
  func.func @transform_1(%arg0: i32, %arg1: i32) -> (i32, i32) {
    %c0_i32 = arith.constant 0 : i32
    %c0_i32_0 = arith.constant 0 : i32
    %c0_i32_1 = arith.constant 0 : i32
    return %c0_i32, %c0_i32_0 : i32, i32
  }
  func.func @transform_2(%arg0: i32, %arg1: i32) -> (i32, i32) {
    %c0_i32 = arith.constant 0 : i32
    %c0_i32_0 = arith.constant 0 : i32
    %c0_i32_1 = arith.constant 0 : i32
    return %c0_i32, %c0_i32_0 : i32, i32
  }
  func.func @transform_3(%arg0: i32, %arg1: i32) -> (i32, i32, i32, i32) {
    %c0_i32 = arith.constant 0 : i32
    %c0_i32_0 = arith.constant 0 : i32
    %c0_i32_1 = arith.constant 0 : i32
    return %arg0, %arg1, %c0_i32, %c0_i32_0 : i32, i32, i32, i32
  }
}

</mosaic_0001>

<bundles_post_ra>
// kernel: spp_forward.1
= control target key start
LH: loop header
LB: loop body
LE: loop exit
PB: predicated region body
PF: predicated region fallthrough
CT: control target
= control target key end

     0   :  { %s2743_s12 = smov 0   ;;  %s2745_s13 = smov 0   ;;  %s3931_s0 = inlined_call_operand.vmem [shape: bf16[2,1,20,1280], index: 0, kind: input, shape index: {}]   ;;  %s3932_s1 = inlined_call_operand.vmem [shape: bf16[8,180], index: 1, kind: input, shape index: {}]   ;;  %s3933_s2 = inlined_call_operand.vmem [shape: f32[8,1], index: 2, kind: input, shape index: {}]   ;;  %s3934_s3 = inlined_call_operand.vmem [shape: bf16[2,1,8,1088], index: 3, kind: output, shape index: {}]  }
   0x1   :  { %s2747_s14 = smov 0  }
   0x2 LB: > { %s25_s15 = sadd.s32 1, %s2708_s13  ;;  %p2492_p0 = scmp.ge.s32.totalorder %s2712_s14, 1  ;;  %s2712_s14 = sphi %s2747_s14, %s13_s14   ;;  %s2708_s13 = sphi %s2745_s13, %s3987_s13   ;;  %s2704_s12 = sphi %s2743_s12, %s3986_s12  }
   0x3   : > { %p27_p1 = scmp.ge.s32.totalorder %s25_s15, 2  ;;  %p157_p2 = scmp.lt.s32.totalorder %s2712_s14, 3 }
   0x5   : > { %s3989_s15 = smov (%p27_p1, %s25_s15), 0  ;;  %p158_p3 = pnand %p2492_p0, %p157_p2 }
   0x6   : > { %p189_p4 = scmp.lt.s32.totalorder (!%p158_p3), %s2704_s12, 1  ;;  %vm270_vm0 = vcmask (!%p158_p3), 1041408   ;;  %vm271_vm1 = vcmask (!%p158_p3), 1045508   ;;  %s2714_s20 = smov (!%p158_p3), 126   ;;  %vm2091_vm3 = vcmask (!%p158_p3), 424960   ;;  %vm353_vm4 = vcmask (!%p158_p3), 1043456  }
   0x7   : > { %161 = sbr.rel (%p158_p3) target bundleno = 613 (0x265), region = 32  ;;  %vm2793_vm2 = vmor (!%p158_p3), %vm270_vm0, %vm271_vm1  ;;  %s2715_s21 = smov (!%p158_p3), 127   ;;  %vm486_vm5 = vcmask (!%p158_p3), 1031168   ;;  %vm355_vm6 = vcmask (!%p158_p3), 1039360   ;;  %vm651_vm7 = vcmask (!%p158_p3), 769024   ;;  %vm781_vm8 = vcmask (!%p158_p3), 760832  }
   0x8   : > { %s2716_s22 = smov (!%p158_p3), 94   ;;  %s2717_s23 = smov (!%p158_p3), 93   ;;  %vm946_vm9 = vcmask (!%p158_p3), 752640   ;;  %vm1076_vm10 = vcmask (!%p158_p3), 490496   ;;  %vm238_vm11 = vcmask (!%p158_p3), 517120   ;;  %vm227_vm12 = vcmask (!%p158_p3), 519168  }
   0x9   : > { %s2718_s24 = smov (!%p158_p3), 92   ;;  %s2719_s25 = smov (!%p158_p3), 60   ;;  %vm1244_vm13 = vcmask (!%p158_p3), 482304   ;;  %vm1377_vm14 = vcmask (!%p158_p3), 474112   ;;  %vm398_vm15 = vcmask (!%p158_p3), 519170  }
   0xa   : > { %s2720_s26 = smov (!%p158_p3), 59   ;;  %s2721_s27 = smov (!%p158_p3), 58  }
   0xe   : > { %s3991_s12 = smov (!%p189_p4, %s2704_s12), 1 }
   0xf   : > { %s2626_s16 = smul.u32 120, %s3991_s12 }
  0x10   : > { %s2627_s5 = smul.u32 36, %s3991_s12 }
  0x11   : > { %s2767_s19 = scalar_lea.vmem %s3931_s0, %s2626_s16 }
  0x12   : > { %v2770_v0 = vld [vmem:[%s2767_s19 + $0x8] sm:$0xff]  ;;  %v2773_v1 = vld [vmem:[%s2767_s19] sm:$0xff]  ;;  %v2790_v6 = vld [vmem:[%s2767_s19 + $0x30] sm:$0xff]  ;;  %s3914_s8 = scalar_lea.vmem %s3934_s3, %s2627_s5 }
  0x13   : > { %v2776_v2 = vld [vmem:[%s2767_s19 + $0x28] sm:$0xff]  ;;  %442 = vrot.lane.b32.xlu1 %v2770_v0, %s2714_s20  ;;  %440 = vrot.lane.b32.xlu0 %v2773_v1, %s2714_s20  ;;  %v2783_v3 = vrot.slane %v2773_v1, 6  ;;  %v2787_v5 = vrot.slane %v2770_v0, 6  ;;  %v282_v10 = vrot.slane %v2790_v6, 6  ;;  %v250_v11 = vld [vmem:[%s2767_s19 + $0x50] sm:$0x33] }
  0x14   : > { %v279_v4 = vrot.slane %v2776_v2, 6  ;;  %v251_v12 = vld [vmem:[%s2767_s19 + $0x58] sm:$0x33]  ;;  %v2498_v13 = vcombine.high %v2773_v1, %v2776_v2  ;;  %v294_v16 = vrot.slane %v250_v11, 6  ;;  %v2497_v17 = vcombine.low %v2773_v1, %v2776_v2  ;;  %v218_v23 = vld [vmem:[%s2767_s19 + $0x50] sm:$0x33] }
  0x15   : > { %v278_v8 = vrot.slane %v2783_v3, 4  ;;  %v281_v9 = vrot.slane %v2787_v5, 4  ;;  %v2820_v19 = vrot.slane %v282_v10, 4  ;;  %v297_v20 = vrot.slane %v251_v12, 6  ;;  %234 = vst [vmem:[#allocation2 + $0x48] sm:$0x33] %v218_v23 }
  0x16   : > { %v2812_v15 = vrot.slane %v279_v4, 4  ;;  %2123 = vmatprep.subr.bf16.mxu0 %v2498_v13  ;;  %v420_v24 = vld [vmem:[%s2767_s19 + $0x50] sm:$0x33]  ;;  %v421_v25 = vld [vmem:[%s2767_s19 + $0x58] sm:$0x33]  ;;  %v2950_v58 = vld [vmem:[%s2767_s19 + $0x40] sm:$0xff] }
  0x17   : > { %308 = vrot.lane.b32.xlu0 %v2783_v3, %s2715_s21  ;;  %v2808_v14 = vsel %vm2793_vm2, %v278_v8, %v279_v4  ;;  %v2818_v18 = vsel %vm2793_vm2, %v281_v9, %v282_v10  ;;  %2124 = vmatpush1.bf16.msra.mxu0 %v2497_v17  ;;  %v298_v22 = vsel %vm2793_vm2, %v2820_v19, %v297_v20  ;;  %v550_v26 = vld [vmem:[%s2767_s19 + $0x50] sm:$0x33]  ;;  %v551_v27 = vld [vmem:[%s2767_s19 + $0x58] sm:$0x33]  ;;  %v209_v59 = vld [vmem:[%s2767_s19 + $0x8] sm:$0xff] }
  0x18   : > { %318 = vrot.lane.b32.xlu1 %v2808_v14, %s2715_s21  ;;  %v295_v21 = vsel %vm2793_vm2, %v2812_v15, %v294_v16  ;;  %v591_v28 = vrot.slane %v550_v26, 6  ;;  %v594_v29 = vrot.slane %v551_v27, 6  ;;  %v715_v32 = vld [vmem:[%s2767_s19 + $0x50] sm:$0x33]  ;;  %v716_v33 = vld [vmem:[%s2767_s19 + $0x58] sm:$0x33] }
  0x19   : > { %v845_v34 = vld [vmem:[%s2767_s19 + $0x50] sm:$0x33]  ;;  %v846_v35 = vld [vmem:[%s2767_s19 + $0x58] sm:$0x33]  ;;  %v220_v61 = vld [vmem:[%s2767_s19 + $0x60] sm:$0x33] }
  0x1a   : > { %v592_v30 = vsel %vm2793_vm2, %v2812_v15, %v591_v28  ;;  %v595_v31 = vsel %vm2793_vm2, %v2820_v19, %v594_v29  ;;  %v886_v36 = vrot.slane %v845_v34, 6  ;;  %v889_v37 = vrot.slane %v846_v35, 6  ;;  %v1010_v40 = vld [vmem:[%s2767_s19 + $0x50] sm:$0x33]  ;;  %v1011_v41 = vld [vmem:[%s2767_s19 + $0x58] sm:$0x33] }
  0x1b   : > { %310 = vrot.lane.b32.xlu0 %v2787_v5, %s2715_s21  ;;  %v1143_v42 = vld [vmem:[%s2767_s19 + $0x50] sm:$0x33]  ;;  %v1144_v43 = vld [vmem:[%s2767_s19 + $0x58] sm:$0x33]  ;;  %236 = vst [vmem:[#allocation2 + $0x58] sm:$0x33] %v220_v61 }
  0x1c   : > { %320 = vrot.lane.b32.xlu1 %v2818_v18, %s2715_s21  ;;  %v887_v38 = vsel %vm2793_vm2, %v2812_v15, %v886_v36  ;;  %v890_v39 = vsel %vm2793_vm2, %v2820_v19, %v889_v37  ;;  %v1184_v44 = vrot.slane %v1143_v42, 6  ;;  %v1187_v45 = vrot.slane %v1144_v43, 6  ;;  %v2922_v48 = vld [vmem:[%s2767_s19 + $0x10] sm:$0xff]  ;;  %v2932_v50 = vld [vmem:[%s2767_s19 + $0x38] sm:$0xff]  ;;  %v2969_v4 = vld [vmem:[%s3932_s1] sm:$0xff] }
  0x1d   : > { %v2929_v49 = vrot.slane %v2922_v48, 6  ;;  %v2935_v51 = vld [vmem:[%s2767_s19 + $0x18] sm:$0xff]  ;;  %v1311_v53 = vld [vmem:[%s2767_s19 + $0x50] sm:$0x33]  ;;  %v285_v56 = vrot.slane %v2932_v50, 6  ;;  %v2980_v9 = vcombine.high %v2969_v4, %v2969_v4 }
  0x1e   : > { %v1185_v46 = vsel %vm2793_vm2, %v2812_v15, %v1184_v44  ;;  %v1188_v47 = vsel %vm2793_vm2, %v2820_v19, %v1187_v45  ;;  %v219_v52 = vld [vmem:[%s2767_s19 + $0x58] sm:$0x33]  ;;  %v2947_v57 = vrot.slane %v2935_v51, 6  ;;  %v214_v60 = vld [vmem:[%s2767_s19 + $0x30] sm:$0xff]  ;;  %v253_v12 = vld [vmem:[%s2767_s19 + $0x68] sm:$0x33] }
  0x1f   : > { %328 = vrot.lane.b32.xlu0 %v295_v21, %s2715_s21  ;;  %235 = vst [vmem:[#allocation2 + $0x50] sm:$0x33] %v219_v52  ;;  %v1312_v54 = vld [vmem:[%s2767_s19 + $0x58] sm:$0x33]  ;;  %v284_v55 = vrot.slane %v2929_v49, 4  ;;  %v2500_v62 = vcombine.high %v209_v59, %v214_v60  ;;  %v2499_v63 = vcombine.low %v209_v59, %v214_v60  ;;  %2606 = vmatprep.mubr.msk.bf16.mxu0 %vm2091_vm3, %v2980_v9  ;;  %v303_v17 = vrot.slane %v253_v12, 6 }
  0x20   : > { %330 = vrot.lane.b32.xlu1 %v298_v22, %s2715_s21  ;;  %v2983_v10 = vld [vmem:[%s2767_s19 + $0x38] sm:$0xff]  ;;  %2608 = vmatprep.mubr.msk.bf16.mxu1 %vm2091_vm3, %v2980_v9  ;;  %v422_v19 = vld [vmem:[%s2767_s19 + $0x60] sm:$0x33]  ;;  %v423_v26 = vld [vmem:[%s2767_s19 + $0x68] sm:$0x33] }
  0x21   : > { %2164 = vmatprep.subr.bf16.mxu1 %v2500_v62 }
  0x22   : > { %2165 = vmatpush1.bf16.msra.mxu1 %v2499_v63 }
  0x23   : > { %450 = vrot.lane.b32.xlu0 %v2776_v2, %s2714_s20 }
  0x24   : > { %452 = vrot.lane.b32.xlu1 %v2790_v6, %s2714_s20 }
  0x27   : > { %460 = vrot.lane.b32.xlu0 %v420_v24, %s2714_s20  ;;  %v552_v24 = vld [vmem:[%s2767_s19 + $0x60] sm:$0x33] }
  0x28   : > { %462 = vrot.lane.b32.xlu1 %v421_v25, %s2714_s20  ;;  %v597_v29 = vrot.slane %v552_v24, 6 }
  0x2b   : > { %605 = vrot.lane.b32.xlu0 %v2783_v3, %s2716_s22 }
  0x2c   : > { %607 = vrot.lane.b32.xlu1 %v2787_v5, %s2716_s22 }
  0x2f   : > { %615 = vrot.lane.b32.xlu0 %v2808_v14, %s2716_s22 }
  0x30   : > { %617 = vrot.lane.b32.xlu1 %v2818_v18, %s2716_s22 }
  0x33   : > { %625 = vrot.lane.b32.xlu0 %v592_v30, %s2716_s22 }
  0x34   : > { %627 = vrot.lane.b32.xlu1 %v595_v31, %s2716_s22  ;;  %v553_v31 = vld [vmem:[%s2767_s19 + $0x68] sm:$0x33] }
  0x35   : > { %v600_v35 = vrot.slane %v553_v31, 6  ;;  %v718_v31 = vld [vmem:[%s2767_s19 + $0x68] sm:$0x33] }
  0x37   : > { %735 = vrot.lane.b32.xlu0 %v2773_v1, %s2717_s23 }
  0x38   : > { %737 = vrot.lane.b32.xlu1 %v2770_v0, %s2717_s23 }
  0x3b   : > { %745 = vrot.lane.b32.xlu0 %v2776_v2, %s2717_s23 }
  0x3c   : > { %747 = vrot.lane.b32.xlu1 %v2790_v6, %s2717_s23 }
  0x3f   : > { %755 = vrot.lane.b32.xlu0 %v715_v32, %s2717_s23 }
  0x40   : > { %757 = vrot.lane.b32.xlu1 %v716_v33, %s2717_s23 }
  0x43   : > { %900 = vrot.lane.b32.xlu0 %v2783_v3, %s2718_s24 }
  0x44   : > { %902 = vrot.lane.b32.xlu1 %v2787_v5, %s2718_s24 }
  0x47   : > { %910 = vrot.lane.b32.xlu0 %v2808_v14, %s2718_s24 }
  0x48   : > { %912 = vrot.lane.b32.xlu1 %v2818_v18, %s2718_s24 }
  0x4b   : > { %920 = vrot.lane.b32.xlu0 %v887_v38, %s2718_s24 }
  0x4c   : > { %922 = vrot.lane.b32.xlu1 %v890_v39, %s2718_s24 }
  0x4f   : > { %1030 = vrot.lane.b32.xlu0 %v2773_v1, %s2719_s25 }
  0x50   : > { %1032 = vrot.lane.b32.xlu1 %v2770_v0, %s2719_s25 }
  0x53   : > { %1040 = vrot.lane.b32.xlu0 %v2776_v2, %s2719_s25 }
  0x54   : > { %1042 = vrot.lane.b32.xlu1 %v2790_v6, %s2719_s25 }
  0x57   : > { %1050 = vrot.lane.b32.xlu0 %v1010_v40, %s2719_s25 }
  0x58   : > { %1052 = vrot.lane.b32.xlu1 %v1011_v41, %s2719_s25 }
  0x5b   : > { %1198 = vrot.lane.b32.xlu0 %v2783_v3, %s2720_s26  ;;  %v252_v3 = vld [vmem:[%s2767_s19 + $0x60] sm:$0x33] }
  0x5c   : > { %1200 = vrot.lane.b32.xlu1 %v2787_v5, %s2720_s26  ;;  %v2972_v5 = vld [vmem:[%s2767_s19 + $0x10] sm:$0xff]  ;;  %v300_v8 = vrot.slane %v252_v3, 6 }
  0x5d   : > { %v2501_v13 = vcombine.low %v2972_v5, %v2983_v10 }
  0x5f   : > { %1208 = vrot.lane.b32.xlu0 %v2808_v14, %s2720_s26  ;;  %v2502_v14 = vcombine.high %v2972_v5, %v2983_v10 }
  0x60   : > { %1210 = vrot.lane.b32.xlu1 %v2818_v18, %s2720_s26 }
  0x63   : > { %1218 = vrot.lane.b32.xlu0 %v1185_v46, %s2720_s26 }
  0x64   : > { %1220 = vrot.lane.b32.xlu1 %v1188_v47, %s2720_s26 }
  0x67   : > { %1331 = vrot.lane.b32.xlu0 %v2773_v1, %s2721_s27  ;;  %v287_v1 = vrot.slane %v2947_v57, 4 }
  0x68   : > { %1333 = vrot.lane.b32.xlu1 %v2770_v0, %s2721_s27  ;;  %v2959_v0 = vsel %vm2793_vm2, %v284_v55, %v285_v56 }
  0x6b   : > { %1341 = vrot.lane.b32.xlu0 %v2776_v2, %s2721_s27  ;;  %v288_v2 = vrot.slane %v2950_v58, 6 }
  0x6c   : > { %1343 = vrot.lane.b32.xlu1 %v2790_v6, %s2721_s27  ;;  %v2976_v6 = vrot.slane %v285_v56, 4 }
  0x6d   : > { %v2987_v11 = vsel %vm2793_vm2, %v287_v1, %v288_v2  ;;  %v3005_v16 = vrot.slane %v288_v2, 4 }
  0x6e   : > { %v301_v15 = vsel %vm2793_vm2, %v2976_v6, %v300_v8  ;;  %v598_v34 = vsel %vm2793_vm2, %v2976_v6, %v597_v29 }
  0x6f   : > { %1351 = vrot.lane.b32.xlu0 %v1311_v53, %s2721_s27  ;;  %v304_v18 = vsel %vm2793_vm2, %v3005_v16, %v303_v17  ;;  %v601_v44 = vsel %vm2793_vm2, %v3005_v16, %v600_v35  ;;  %v717_v17 = vld [vmem:[%s2767_s19 + $0x60] sm:$0x33] }
  0x70   : > { %1353 = vrot.lane.b32.xlu1 %v1312_v54, %s2721_s27 }
  0x73   : > { %312 = vrot.lane.b32.xlu0 %v2929_v49, %s2715_s21 }
  0x74   : > { %322 = vrot.lane.b32.xlu1 %v2959_v0, %s2715_s21 }
  0x77   : > { %314 = vrot.lane.b32.xlu0 %v2947_v57, %s2715_s21 }
  0x78   : > { %324 = vrot.lane.b32.xlu1 %v2987_v11, %s2715_s21 }
  0x7b   : > { %332 = vrot.lane.b32.xlu0 %v301_v15, %s2715_s21 }
  0x7c   : > { %444 = vrot.lane.b32.xlu1 %v2922_v48, %s2714_s20 }
  0x7f   : > { %334 = vrot.lane.b32.xlu0 %v304_v18, %s2715_s21 }
  0x80   : > { %446 = vrot.lane.b32.xlu1 %v2935_v51, %s2714_s20 }
  0x83   : > { %454 = vrot.lane.b32.xlu0 %v2932_v50, %s2714_s20 }
  0x84   : > { %464 = vrot.lane.b32.xlu1 %v422_v19, %s2714_s20 }
  0x85   : > { %v3020_v20 = vpop.permute.xlu1 %442  ;;  %v441_v21 = vpop.permute.xlu0 %440 }
  0x86   : > { %v471_v22 = vrot.slane %v3020_v20, 4  ;;  %v470_v23 = vrot.slane %v441_v21, 4 }
  0x87   : > { %609 = vrot.lane.b32.xlu0 %v2929_v49, %s2716_s22 }
  0x88   : > { %v485_v25 = vsel %vm353_vm4, %v470_v23, %v471_v22  ;;  %456 = vrot.lane.b32.xlu1 %v2950_v58, %s2714_s20 }
  0x89   : > { %v3033_v27 = vsel %vm486_vm5, %v441_v21, %v485_v25  ;;  %v309_v28 = vpop.permute.xlu0 %308 }
  0x8a   : > { %v319_v30 = vpop.permute.xlu1 %318  ;;  %v338_v36 = vrot.slane %v309_v28, 4 }
  0x8b   : > { %466 = vrot.lane.b32.xlu0 %v423_v26, %s2714_s20  ;;  %v343_v32 = vrot.slane %v319_v30, 4 }
  0x8c   : > { %611 = vrot.lane.b32.xlu1 %v2947_v57, %s2716_s22 }
  0x8d   : > { %v3039_v33 = vpop.permute.xlu0 %310 }
  0x8e   : > { %v339_v37 = vrot.slane %v3039_v33, 4  ;;  %v3045_v38 = vpop.permute.xlu1 %320 }
  0x8f   : > { %v344_v39 = vrot.slane %v3045_v38, 4  ;;  %619 = vrot.lane.b32.xlu0 %v2959_v0, %s2716_s22 }
  0x90   : > { %v354_v40 = vsel %vm353_vm4, %v338_v36, %v339_v37  ;;  %629 = vrot.lane.b32.xlu1 %v598_v34, %s2716_s22 }
  0x91   : > { %v356_v41 = vsel %vm355_vm6, %v309_v28, %v354_v40  ;;  %v363_v42 = vsel %vm353_vm4, %v343_v32, %v344_v39  ;;  %v329_v43 = vpop.permute.xlu0 %328  ;;  %v847_v32 = vld [vmem:[%s2767_s19 + $0x60] sm:$0x33] }
  0x92   : > { %394 = vst [vmem:[#allocation2 + $0x48] sm:$0xcc] %v356_v41  ;;  %v364_v45 = vsel %vm355_vm6, %v319_v30, %v363_v42  ;;  %v348_v46 = vrot.slane %v329_v43, 4  ;;  %v3062_v47 = vpop.permute.xlu1 %330  ;;  %v892_v40 = vrot.slane %v847_v32, 6 }
  0x93   : > { %v349_v52 = vrot.slane %v3062_v47, 4  ;;  %621 = vrot.lane.b32.xlu0 %v2987_v11, %s2716_s22 }
  0x94   : > { %631 = vrot.lane.b32.xlu1 %v601_v44, %s2716_s22 }
  0x95   : > { %v371_v53 = vsel %vm353_vm4, %v348_v46, %v349_v52  ;;  %v451_v54 = vpop.permute.xlu0 %450 }
  0x96   : > { %v372_v55 = vsel %vm355_vm6, %v329_v43, %v371_v53  ;;  %v475_v56 = vrot.slane %v451_v54, 4  ;;  %v3072_v59 = vpop.permute.xlu1 %452  ;;  %v848_v43 = vld [vmem:[%s2767_s19 + $0x68] sm:$0x33] }
  0x97   : > { %v476_v60 = vrot.slane %v3072_v59, 4  ;;  %739 = vrot.lane.b32.xlu0 %v2922_v48, %s2717_s23  ;;  %v2516_v18 = vcombine.high %v372_v55, %v3033_v27  ;;  %v2515_v28 = vcombine.low %v372_v55, %v3033_v27  ;;  %v895_v55 = vrot.slane %v848_v43, 6 }
  0x98   : > { %749 = vrot.lane.b32.xlu1 %v2932_v50, %s2717_s23 }
  0x99   : > { %v494_v61 = vsel %vm353_vm4, %v475_v56, %v476_v60  ;;  %v461_v62 = vpop.permute.xlu0 %460  ;;  %v1445_v63 = vld [vmem:[#allocation2 + $0x48] sm:$0xff] }
  0x9a   : > { %v3083_v1 = vsel %vm486_vm5, %v451_v54, %v494_v61  ;;  %v480_v2 = vrot.slane %v461_v62, 4  ;;  %v3085_v3 = vpop.permute.xlu1 %462  ;;  %v2507_v8 = vcombine.high %v1445_v63, %v364_v45  ;;  %v2506_v12 = vcombine.low %v1445_v63, %v364_v45 }
  0x9b   : > { %v481_v15 = vrot.slane %v3085_v3, 4  ;;  %741 = vrot.lane.b32.xlu0 %v2935_v51, %s2717_s23  ;;  %v893_v54 = vsel %vm2793_vm2, %v2976_v6, %v892_v40 }
  0x9c   : > { %751 = vrot.lane.b32.xlu1 %v2950_v58, %s2717_s23  ;;  %2125 = vmatprep.subr.bf16.mxu0 %v2507_v8 }
  0x9d   : > { %v502_v19 = vsel %vm353_vm4, %v480_v2, %v481_v15  ;;  %v606_v21 = vpop.permute.xlu0 %605  ;;  %2126 = vmatpush1.bf16.msra.mxu0 %v2506_v12 }
  0x9e   : > { %v503_v23 = vsel %vm486_vm5, %v461_v62, %v502_v19  ;;  %v635_v24 = vrot.slane %v606_v21, 4  ;;  %v3098_v25 = vpop.permute.xlu1 %607  ;;  %2127 = vmatprep.subr.bf16.mxu0 %v2516_v18  ;;  %v896_v19 = vsel %vm2793_vm2, %v3005_v16, %v895_v55 }
  0x9f   : > { %535 = vst [vmem:[#allocation2 + $0xfc] sm:$0x33] %v503_v23  ;;  %v636_v26 = vrot.slane %v3098_v25, 4  ;;  %759 = vrot.lane.b32.xlu0 %v717_v17, %s2717_s23 }
  0xa0   : > { %904 = vrot.lane.b32.xlu1 %v2929_v49, %s2718_s24 }
  0xa1   : > { %v650_v29 = vsel %vm353_vm4, %v635_v24, %v636_v26  ;;  %v616_v30 = vpop.permute.xlu0 %615  ;;  %2128 = vmatpush1.bf16.msra.mxu0 %v2515_v28 }
  0xa2   : > { %v652_v34 = vsel %vm651_vm7, %v606_v21, %v650_v29  ;;  %v640_v35 = vrot.slane %v616_v30, 4  ;;  %v3111_v36 = vpop.permute.xlu1 %617 }
  0xa3   : > { %690 = vst [vmem:[#allocation2 + $0xfc] sm:$0xcc] %v652_v34  ;;  %v641_v27 = vrot.slane %v3111_v36, 4  ;;  %914 = vrot.lane.b32.xlu0 %v2959_v0, %s2718_s24 }
  0xa4   : > { %761 = vrot.lane.b32.xlu1 %v718_v31, %s2717_s23 }
  0xa5   : > { %v659_v41 = vsel %vm353_vm4, %v640_v35, %v641_v27  ;;  %v626_v42 = vpop.permute.xlu0 %625  ;;  %v1012_v35 = vld [vmem:[%s2767_s19 + $0x60] sm:$0x33] }
  0xa6   : > { %v660_v44 = vsel %vm651_vm7, %v616_v30, %v659_v41  ;;  %v645_v45 = vrot.slane %v626_v42, 4  ;;  %v3122_v46 = vpop.permute.xlu1 %627 }
  0xa7   : > { %v646_v53 = vrot.slane %v3122_v46, 4  ;;  %906 = vrot.lane.b32.xlu0 %v2947_v57, %s2718_s24 }
  0xa8   : > { %916 = vrot.lane.b32.xlu1 %v2987_v11, %s2718_s24 }
  0xa9   : > { %v667_v56 = vsel %vm353_vm4, %v645_v45, %v646_v53  ;;  %v736_v61 = vpop.permute.xlu0 %735 }
  0xaa   : > { %v668_v62 = vsel %vm651_vm7, %v626_v42, %v667_v56  ;;  %v765_v63 = vrot.slane %v736_v61, 4  ;;  %v3136_v2 = vpop.permute.xlu1 %737  ;;  %v1470_v8 = vld [vmem:[#allocation2 + $0xfc] sm:$0xff] }
  0xab   : > { %v3953_v12 = vrot.slane %v3136_v2, 4  ;;  %924 = vrot.lane.b32.xlu0 %v893_v54, %s2718_s24  ;;  %v2525_v17 = vcombine.high %v3083_v1, %v1470_v8  ;;  %v2524_v18 = vcombine.low %v3083_v1, %v1470_v8  ;;  %v2534_v24 = vcombine.high %v660_v44, %v668_v62 }
  0xac   : > { %1034 = vrot.lane.b32.xlu1 %v2922_v48, %s2719_s25  ;;  %v2533_v31 = vcombine.low %v660_v44, %v668_v62 }
  0xad   : > { %v780_v21 = vsel %vm353_vm4, %v765_v63, %v3953_v12  ;;  %v746_v23 = vpop.permute.xlu0 %745  ;;  %2129 = vmatprep.subr.bf16.mxu0 %v2525_v17  ;;  %v1145_v63 = vld [vmem:[%s2767_s19 + $0x60] sm:$0x33]  ;;  %v1013_v17 = vld [vmem:[%s2767_s19 + $0x68] sm:$0x33] }
  0xae   : > { %v782_v28 = vsel %vm781_vm8, %v736_v61, %v780_v21  ;;  %v770_v29 = vrot.slane %v746_v23, 4  ;;  %v3151_v30 = vpop.permute.xlu1 %747  ;;  %2130 = vmatpush1.bf16.msra.mxu0 %v2524_v18  ;;  %v1190_v21 = vrot.slane %v1145_v63, 6 }
  0xaf   : > { %v3949_v1 = vrot.slane %v3151_v30, 4  ;;  %926 = vrot.lane.b32.xlu0 %v896_v19, %s2718_s24  ;;  %2131 = vmatprep.subr.bf16.mxu0 %v2534_v24 }
  0xb0   : > { %1036 = vrot.lane.b32.xlu1 %v2935_v51, %s2719_s25 }
  0xb1   : > { %v789_v32 = vsel %vm353_vm4, %v770_v29, %v3949_v1  ;;  %v756_v34 = vpop.permute.xlu0 %755  ;;  %v1146_v29 = vld [vmem:[%s2767_s19 + $0x68] sm:$0x33] }
  0xb2   : > { %v790_v40 = vsel %vm781_vm8, %v746_v23, %v789_v32  ;;  %v775_v41 = vrot.slane %v756_v34, 4  ;;  %v3162_v42 = vpop.permute.xlu1 %757  ;;  %2132 = vmatpush1.bf16.msra.mxu0 %v2533_v31 }
  0xb3   : > { %v3946_v43 = vrot.slane %v3162_v42, 4  ;;  %1044 = vrot.lane.b32.xlu0 %v2932_v50, %s2719_s25  ;;  %v2543_v45 = vcombine.high %v782_v28, %v790_v40  ;;  %v2542_v44 = vcombine.low %v782_v28, %v790_v40 }
  0xb4   : > { %1054 = vrot.lane.b32.xlu1 %v1012_v35, %s2719_s25  ;;  %v1193_v35 = vrot.slane %v1146_v29, 6  ;;  %v244_v29 = vld [vmem:[%s2767_s19 + $0x20] sm:$0xf] }
  0xb5   : > { %v797_v54 = vsel %vm353_vm4, %v775_v41, %v3946_v43  ;;  %v901_v55 = vpop.permute.xlu0 %900  ;;  %2133 = vmatprep.subr.bf16.mxu0 %v2543_v45 }
  0xb6   : > { %v798_v56 = vsel %vm781_vm8, %v756_v34, %v797_v54  ;;  %v930_v61 = vrot.slane %v901_v55, 4  ;;  %v3172_v62 = vpop.permute.xlu1 %902  ;;  %2134 = vmatpush1.bf16.msra.mxu0 %v2542_v44  ;;  %v1191_v34 = vsel %vm2793_vm2, %v2976_v6, %v1190_v21  ;;  %v1194_v6 = vsel %vm2793_vm2, %v3005_v16, %v1193_v35 }
  0xb7   : > { %830 = vst [vmem:[#allocation2 + $0x1b0] sm:$0x33] %v798_v56  ;;  %v3945_v8 = vrot.slane %v3172_v62, 4  ;;  %1202 = vrot.lane.b32.xlu0 %v2929_v49, %s2720_s26 }
  0xb8   : > { %1046 = vrot.lane.b32.xlu1 %v2950_v58, %s2719_s25 }
  0xb9   : > { %v945_v18 = vsel %vm353_vm4, %v930_v61, %v3945_v8  ;;  %v911_v19 = vpop.permute.xlu0 %910 }
  0xba   : > { %v947_v23 = vsel %vm946_vm9, %v901_v55, %v945_v18  ;;  %v935_v24 = vrot.slane %v911_v19, 4  ;;  %v3185_v28 = vpop.permute.xlu1 %912 }
  0xbb   : > { %985 = vst [vmem:[#allocation2 + $0x1b0] sm:$0xcc] %v947_v23  ;;  %v3944_v31 = vrot.slane %v3185_v28, 4  ;;  %1056 = vrot.lane.b32.xlu0 %v1013_v17, %s2719_s25 }
  0xbc   : > { %1204 = vrot.lane.b32.xlu1 %v2947_v57, %s2720_s26 }
  0xbd   : > { %v954_v49 = vsel %vm353_vm4, %v935_v24, %v3944_v31  ;;  %v921_v32 = vpop.permute.xlu0 %920 }
  0xbe   : > { %v955_v40 = vsel %vm946_vm9, %v911_v19, %v954_v49  ;;  %v940_v41 = vrot.slane %v921_v32, 4  ;;  %v3199_v45 = vpop.permute.xlu1 %922 }
  0xbf   : > { %v3942_v44 = vrot.slane %v3199_v45, 4  ;;  %1212 = vrot.lane.b32.xlu0 %v2959_v0, %s2720_s26 }
  0xc0   : > { %1222 = vrot.lane.b32.xlu1 %v1191_v34, %s2720_s26 }
  0xc1   : > { %v962_v57 = vsel %vm353_vm4, %v940_v41, %v3942_v44  ;;  %v1031_v54 = vpop.permute.xlu0 %1030  ;;  %v277_v41 = vrot.slane %v244_v29, 6  ;;  %v217_v29 = vld [vmem:[%s2767_s19 + $0x48] sm:$0xf] }
  0xc2   : > { %v963_v55 = vsel %vm946_vm9, %v921_v32, %v962_v57  ;;  %v1060_v56 = vrot.slane %v1031_v54, 4  ;;  %v3212_v61 = vpop.permute.xlu1 %1032  ;;  %v1495_v63 = vld [vmem:[#allocation2 + $0x1b0] sm:$0xff]  ;;  %v249_v57 = vld [vmem:[%s2767_s19 + $0x48] sm:$0xf]  ;;  %233 = vst.msk [vmem:[#allocation2 + $0x44] sm:$0xf] %vm227_vm12, %v217_v29 }
  0xc3   : > { %v3939_v0 = vrot.slane %v3212_v61, 4  ;;  %1214 = vrot.lane.b32.xlu0 %v2987_v11, %s2720_s26  ;;  %v2552_v17 = vcombine.high %v1495_v63, %v955_v40  ;;  %v2551_v18 = vcombine.low %v1495_v63, %v955_v40  ;;  %v222_v11 = vld [vmem:[%s2767_s19 + $0x70] sm:$0x3]  ;;  %v1314_v63 = vld [vmem:[%s2767_s19 + $0x68] sm:$0x33]  ;;  %v3273_v29 = vld [vmem:[%s2767_s19 + $0x18] sm:$0xff] }
  0xc4   : > { %1224 = vrot.lane.b32.xlu1 %v1194_v6, %s2720_s26  ;;  %239 = vst.msk [vmem:[#allocation2 + $0x68] sm:$0x3] %vm238_vm11, %v222_v11 }
  0xc5   : > { %v1075_v16 = vsel %vm353_vm4, %v1060_v56, %v3939_v0  ;;  %v1041_v19 = vpop.permute.xlu0 %1040  ;;  %2135 = vmatprep.subr.bf16.mxu0 %v2552_v17  ;;  %v1313_v56 = vld [vmem:[%s2767_s19 + $0x60] sm:$0x33]  ;;  %v291_v17 = vrot.slane %v249_v57, 6 }
  0xc6   : > { %v1077_v21 = vsel %vm1076_vm10, %v1031_v54, %v1075_v16  ;;  %v1065_v23 = vrot.slane %v1041_v19, 4  ;;  %v3222_v24 = vpop.permute.xlu1 %1042  ;;  %2136 = vmatpush1.bf16.msra.mxu0 %v2551_v18  ;;  %v254_v18 = vld [vmem:[%s2767_s19 + $0x70] sm:$0x3] }
  0xc7   : > { %v3938_v49 = vrot.slane %v3222_v24, 4  ;;  %1335 = vrot.lane.b32.xlu0 %v2922_v48, %s2721_s27  ;;  %v2561_v32 = vcombine.high %v963_v55, %v1077_v21  ;;  %v2560_v34 = vcombine.low %v963_v55, %v1077_v21  ;;  %v290_v21 = vrot.slane %v277_v41, 4 }
  0xc8   : > { %1345 = vrot.lane.b32.xlu1 %v2932_v50, %s2721_s27  ;;  %v221_v50 = vld [vmem:[%s2767_s19 + $0x68] sm:$0x33] }
  0xc9   : > { %v1085_v35 = vsel %vm353_vm4, %v1065_v23, %v3938_v49  ;;  %v1051_v40 = vpop.permute.xlu0 %1050  ;;  %2137 = vmatprep.subr.bf16.mxu0 %v2561_v32  ;;  %237 = vst [vmem:[#allocation2 + $0x60] sm:$0x33] %v221_v50  ;;  %v212_v23 = vld [vmem:[%s2767_s19 + $0x20] sm:$0xf] }
  0xca   : > { %v3237_v48 = vsel %vm1076_vm10, %v1041_v19, %v1085_v35  ;;  %v1070_v54 = vrot.slane %v1051_v40, 4  ;;  %v3239_v6 = vpop.permute.xlu1 %1052  ;;  %2138 = vmatpush1.bf16.msra.mxu0 %v2560_v34  ;;  %228 = vst.msk [vmem:[#allocation2 + $0x20] sm:$0xf] %vm227_vm12, %v212_v23  ;;  %v305_v34 = vrot.slane %v291_v17, 4  ;;  %v306_v35 = vrot.slane %v254_v18, 6 }
  0xcb   : > { %v3936_v55 = vrot.slane %v3239_v6, 4  ;;  %1337 = vrot.lane.b32.xlu0 %v2935_v51, %s2721_s27 }
  0xcc   : > { %1347 = vrot.lane.b32.xlu1 %v2950_v58, %s2721_s27 }
  0xcd   : > { %v1094_v16 = vsel %vm353_vm4, %v1070_v54, %v3936_v55  ;;  %v1199_v19 = vpop.permute.xlu0 %1198  ;;  %v292_v54 = vsel %vm2793_vm2, %v290_v21, %v291_v17  ;;  %v307_v17 = vsel %vm2793_vm2, %v305_v34, %v306_v35  ;;  %v549_v21 = vld [vmem:[%s2767_s19 + $0x48] sm:$0xf]  ;;  %v3940_v55 = vmov 0  }
  0xce   : > { %v1095_v11 = vsel %vm1076_vm10, %v1051_v40, %v1094_v16  ;;  %v1228_v51 = vrot.slane %v1199_v19, 4  ;;  %v3256_v32 = vpop.permute.xlu1 %1200  ;;  %2661 = vset.pattern.permute.xlu0 %v3940_v55  ;;  %v419_v35 = vld [vmem:[%s2767_s19 + $0x48] sm:$0xf] }
  0xcf   : > { %1128 = vst [vmem:[#allocation2 + $0x264] sm:$0x33] %v1095_v11  ;;  %v3935_v58 = vrot.slane %v3256_v32, 4  ;;  %1355 = vrot.lane.b32.xlu0 %v1313_v56, %s2721_s27  ;;  %v544_v56 = vld [vmem:[%s2767_s19 + $0x20] sm:$0xf] }
  0xd0   : > { %1357 = vrot.lane.b32.xlu1 %v1314_v63, %s2721_s27  ;;  %v3276_v63 = vld [vmem:[%s2767_s19 + $0x40] sm:$0xff] }
  0xd1   : > { %v1243_v40 = vsel %vm353_vm4, %v1228_v51, %v3935_v58  ;;  %v1209_v57 = vpop.permute.xlu0 %1208  ;;  %v588_v51 = vrot.slane %v549_v21, 6 }
  0xd2   : > { %v1245_v50 = vsel %vm1244_vm13, %v1199_v19, %v1243_v40  ;;  %v1233_v16 = vrot.slane %v1209_v57, 4  ;;  %v3269_v23 = vpop.permute.xlu1 %1210  ;;  %v414_v19 = vld [vmem:[%s2767_s19 + $0x20] sm:$0xf] }
  0xd3   : > { %1286 = vst [vmem:[#allocation2 + $0x264] sm:$0xcc] %v1245_v50  ;;  %v3937_v18 = vrot.slane %v3269_v23, 4  ;;  %316 = vrot.lane.b32.xlu0 %v277_v41, %s2715_s21  ;;  %v574_v50 = vrot.slane %v544_v56, 6 }
  0xd4   : > { %326 = vrot.lane.b32.xlu1 %v292_v54, %s2715_s21 }
  0xd5   : > { %v1253_v40 = vsel %vm353_vm4, %v1233_v16, %v3937_v18  ;;  %v1219_v41 = vpop.permute.xlu0 %1218  ;;  %v554_v18 = vld [vmem:[%s2767_s19 + $0x70] sm:$0x3] }
  0xd6   : > { %v1254_v11 = vsel %vm1244_vm13, %v1209_v57, %v1253_v40  ;;  %v1238_v54 = vrot.slane %v1219_v41, 4  ;;  %v3293_v58 = vpop.permute.xlu1 %1220  ;;  %v424_v57 = vld [vmem:[%s2767_s19 + $0x70] sm:$0x3]  ;;  %v587_v40 = vrot.slane %v574_v50, 4 }
  0xd7   : > { %v3943_v34 = vrot.slane %v3293_v58, 4  ;;  %336 = vrot.lane.b32.xlu0 %v307_v17, %s2715_s21 }
  0xd8   : > { %448 = vrot.lane.b32.xlu1 %v414_v19, %s2714_s20  ;;  %v589_v31 = vsel %vm2793_vm2, %v587_v40, %v588_v51  ;;  %v709_v40 = vld [vmem:[%s2767_s19 + $0x20] sm:$0xf] }
  0xd9   : > { %v1262_v16 = vsel %vm353_vm4, %v1238_v54, %v3943_v34  ;;  %v1332_v56 = vpop.permute.xlu0 %1331  ;;  %v602_v54 = vrot.slane %v588_v51, 4  ;;  %v603_v34 = vrot.slane %v554_v18, 6 }
  0xda   : > { %v1263_v49 = vsel %vm1244_vm13, %v1219_v41, %v1262_v16  ;;  %v1361_v0 = vrot.slane %v1332_v56, 4  ;;  %v3306_v55 = vpop.permute.xlu1 %1333  ;;  %v1520_v44 = vld [vmem:[#allocation2 + $0x264] sm:$0xff] }
  0xdb   : > { %v3948_v17 = vrot.slane %v3306_v55, 4  ;;  %458 = vrot.lane.b32.xlu0 %v419_v35, %s2714_s20  ;;  %v2570_v19 = vcombine.high %v3237_v48, %v1520_v44  ;;  %v2569_v21 = vcombine.low %v3237_v48, %v1520_v44  ;;  %v2579_v8 = vcombine.high %v1254_v11, %v1263_v49  ;;  %v839_v48 = vld [vmem:[%s2767_s19 + $0x20] sm:$0xf] }
  0xdc   : > { %468 = vrot.lane.b32.xlu1 %v424_v57, %s2714_s20  ;;  %v2578_v51 = vcombine.low %v1254_v11, %v1263_v49 }
  0xdd   : > { %v1376_v41 = vsel %vm353_vm4, %v1361_v0, %v3948_v17  ;;  %v1342_v16 = vpop.permute.xlu0 %1341  ;;  %2139 = vmatprep.subr.bf16.mxu0 %v2570_v19  ;;  %v604_v0 = vsel %vm2793_vm2, %v602_v54, %v603_v34  ;;  %v869_v19 = vrot.slane %v839_v48, 6  ;;  %v719_v48 = vld [vmem:[%s2767_s19 + $0x70] sm:$0x3] }
  0xde   : > { %v1378_v35 = vsel %vm1377_vm14, %v1332_v56, %v1376_v41  ;;  %v1366_v43 = vrot.slane %v1342_v16, 4  ;;  %v3319_v44 = vpop.permute.xlu1 %1343  ;;  %2140 = vmatpush1.bf16.msra.mxu0 %v2569_v21  ;;  %v844_v21 = vld [vmem:[%s2767_s19 + $0x48] sm:$0xf] }
  0xdf   : > { %v3947_v18 = vrot.slane %v3319_v44, 4  ;;  %613 = vrot.lane.b32.xlu0 %v574_v50, %s2716_s22  ;;  %2141 = vmatprep.subr.bf16.mxu0 %v2579_v8  ;;  %v883_v34 = vrot.slane %v844_v21, 6 }
  0xe0   : > { %623 = vrot.lane.b32.xlu1 %v589_v31, %s2716_s22 }
  0xe1   : > { %v1386_v56 = vsel %vm353_vm4, %v1366_v43, %v3947_v18  ;;  %v1352_v57 = vpop.permute.xlu0 %1351  ;;  %v714_v43 = vld [vmem:[%s2767_s19 + $0x48] sm:$0xf]  ;;  %v849_v18 = vld [vmem:[%s2767_s19 + $0x70] sm:$0x3] }
  0xe2   : > { %v1387_v41 = vsel %vm1377_vm14, %v1342_v16, %v1386_v56  ;;  %v1371_v8 = vrot.slane %v1352_v57, 4  ;;  %v3333_v50 = vpop.permute.xlu1 %1353  ;;  %2142 = vmatpush1.bf16.msra.mxu0 %v2578_v51  ;;  %v882_v56 = vrot.slane %v869_v19, 4  ;;  %v898_v21 = vrot.slane %v849_v18, 6 }
  0xe3   : > { %v3952_v31 = vrot.slane %v3333_v50, 4  ;;  %633 = vrot.lane.b32.xlu0 %v604_v0, %s2716_s22  ;;  %v2588_v49 = vcombine.high %v1378_v35, %v1387_v41  ;;  %v2587_v11 = vcombine.low %v1378_v35, %v1387_v41 }
  0xe4   : > { %743 = vrot.lane.b32.xlu1 %v709_v40, %s2717_s23  ;;  %v897_v40 = vrot.slane %v883_v34, 4 }
  0xe5   : > { %v1395_v54 = vsel %vm353_vm4, %v1371_v8, %v3952_v31  ;;  %v313_v16 = vpop.permute.xlu0 %312  ;;  %2143 = vmatprep.subr.bf16.mxu0 %v2588_v49  ;;  %v884_v49 = vsel %vm2793_vm2, %v882_v56, %v883_v34  ;;  %v3373_v34 = vld [vmem:[%s2767_s19 + $0x20] sm:$0xff] }
  0xe6   : > { %v1396_v51 = vsel %vm1377_vm14, %v1352_v57, %v1395_v54  ;;  %v340_v17 = vrot.slane %v313_v16, 4  ;;  %v323_v1 = vpop.permute.xlu1 %322  ;;  %2144 = vmatpush1.bf16.msra.mxu0 %v2587_v11 }
  0xe7   : > { %1429 = vst [vmem:[#allocation2 + $0x318] sm:$0x33] %v1396_v51  ;;  %v345_v35 = vrot.slane %v323_v1, 4  ;;  %753 = vrot.lane.b32.xlu0 %v714_v43, %s2717_s23 }
  0xe8   : > { %v357_v0 = vsel %vm353_vm4, %v339_v37, %v340_v17  ;;  %763 = vrot.lane.b32.xlu1 %v719_v48, %s2717_s23  ;;  %v1167_v48 = vrot.slane %v3373_v34, 6 }
  0xe9   : > { %v358_v41 = vsel %vm355_vm6, %v3039_v33, %v357_v0  ;;  %v365_v57 = vsel %vm353_vm4, %v344_v39, %v345_v35  ;;  %v3355_v8 = vpop.permute.xlu0 %314  ;;  %v899_v39 = vsel %vm2793_vm2, %v897_v40, %v898_v21 }
  0xea   : > { %395 = vst [vmem:[#allocation2 + $0x50] sm:$0xcc] %v358_v41  ;;  %v366_v37 = vsel %vm355_vm6, %v3045_v38, %v365_v57  ;;  %v3951_v11 = vrot.slane %v3355_v8, 4  ;;  %v3362_v43 = vpop.permute.xlu1 %324  ;;  %v3385_v41 = vld [vmem:[%s2767_s19 + $0x48] sm:$0xff]  ;;  %v3395_v57 = vcombine.low %v2969_v4, %v2969_v4 }
  0xeb   : > { %v3950_v18 = vrot.slane %v3362_v43, 4  ;;  %908 = vrot.lane.b32.xlu0 %v869_v19, %s2718_s24 }
  0xec   : > { %v359_v33 = vsel %vm353_vm4, %v340_v17, %v3951_v11  ;;  %918 = vrot.lane.b32.xlu1 %v884_v49, %s2718_s24  ;;  %v1181_v49 = vrot.slane %v3385_v41, 6 }
  0xed   : > { %v360_v38 = vsel %vm355_vm6, %v313_v16, %v359_v33  ;;  %v367_v54 = vsel %vm353_vm4, %v345_v35, %v3950_v18  ;;  %v333_v19 = vpop.permute.xlu0 %332  ;;  %v1147_v18 = vld [vmem:[%s2767_s19 + $0x70] sm:$0x33] }
  0xee   : > { %396 = vst [vmem:[#allocation2 + $0x58] sm:$0xcc] %v360_v38  ;;  %v3381_v17 = vsel %vm355_vm6, %v323_v1, %v367_v54  ;;  %v350_v56 = vrot.slane %v333_v19, 4  ;;  %v445_v51 = vpop.permute.xlu1 %444  ;;  %v1545_v0 = vld [vmem:[#allocation2 + $0x318] sm:$0x33] }
  0xef   : > { %v472_v40 = vrot.slane %v445_v51, 4  ;;  %928 = vrot.lane.b32.xlu0 %v899_v39, %s2718_s24  ;;  %v2597_v16 = vcombine.high %v1545_v0, %v1545_v0  ;;  %v2596_v21 = vcombine.low %v1545_v0, %v1545_v0  ;;  %v1014_v1 = vld [vmem:[%s2767_s19 + $0x70] sm:$0x33]  ;;  %v1180_v0 = vrot.slane %v1167_v48, 4 }
  0xf0   : > { %v373_v35 = vsel %vm353_vm4, %v349_v52, %v350_v56  ;;  %1038 = vrot.lane.b32.xlu1 %v3373_v34, %s2719_s25 }
  0xf1   : > { %v374_v33 = vsel %vm355_vm6, %v3062_v47, %v373_v35  ;;  %v488_v39 = vsel %vm353_vm4, %v471_v22, %v472_v40  ;;  %v3403_v38 = vpop.permute.xlu0 %334  ;;  %2605 = vmatprep.subr.msk.bf16.mxu0 %vm270_vm0, %v2597_v16  ;;  %v2097_v52 = vsel %vm270_vm0, %v2596_v21, 0  ;;  %v1446_v54 = vld [vmem:[#allocation2 + $0x50] sm:$0xff]  ;;  %v1195_v21 = vrot.slane %v1181_v49, 4 }
  0xf2   : > { %v489_v4 = vsel %vm486_vm5, %v3020_v20, %v488_v39  ;;  %v351_v11 = vrot.slane %v3403_v38, 4  ;;  %v3411_v31 = vpop.permute.xlu1 %446  ;;  %2146 = vmatpush1.bf16.msra.mxu0 %v2097_v52  ;;  %v2509_v47 = vcombine.high %v1446_v54, %v366_v37  ;;  %v2508_v35 = vcombine.low %v1446_v54, %v366_v37 }
  0xf3   : > { %v473_v22 = vrot.slane %v3411_v31, 4  ;;  %1048 = vrot.lane.b32.xlu0 %v3385_v41, %s2719_s25  ;;  %2205 = vmatprep.subr.bf16.mxu0 %v2502_v14  ;;  %v2518_v16 = vcombine.high %v374_v33, %v489_v4  ;;  %v1196_v39 = vrot.slane %v1147_v18, 6  ;;  %v1182_v14 = vsel %vm2793_vm2, %v1180_v0, %v1181_v49 }
  0xf4   : > { %v375_v20 = vsel %vm353_vm4, %v350_v56, %v351_v11  ;;  %1058 = vrot.lane.b32.xlu1 %v1014_v1, %s2719_s25  ;;  %2166 = vmatprep.subr.bf16.mxu1 %v2509_v47 }
  0xf5   : > { %v376_v37 = vsel %vm355_vm6, %v333_v19, %v375_v20  ;;  %v490_v52 = vsel %vm353_vm4, %v472_v40, %v473_v22  ;;  %v455_v54 = vpop.permute.xlu0 %454  ;;  %2156 = vmatmul.mubr.bf16.vlgmr.msra.gmra.mrb[0].mxu0 %v3395_v57  ;;  %2167 = vmatpush1.bf16.msra.mxu1 %v2508_v35  ;;  %v1447_v12 = vld [vmem:[#allocation2 + $0x58] sm:$0xff]  ;;  %v2517_v40 = vcombine.low %v374_v33, %v489_v4  ;;  %v1315_v35 = vld [vmem:[%s2767_s19 + $0x70] sm:$0x33] }
  0xf6   : > { %v491_v56 = vsel %vm486_vm5, %v445_v51, %v490_v52  ;;  %v477_v1 = vrot.slane %v455_v54, 4  ;;  %v465_v47 = vpop.permute.xlu1 %464  ;;  %2206 = vmatpush1.bf16.msra.mxu0 %v2501_v13  ;;  %v2511_v18 = vcombine.high %v1447_v12, %v3381_v17  ;;  %2168 = vmatprep.subr.bf16.mxu1 %v2518_v16  ;;  %v2510_v49 = vcombine.low %v1447_v12, %v3381_v17 }
  0xf7   : > { %v482_v19 = vrot.slane %v465_v47, 4  ;;  %1206 = vrot.lane.b32.xlu0 %v1167_v48, %s2720_s26  ;;  %2610 = vmatprep.mubr.msk.bf16.mxu0 %vm2091_vm3, %v2980_v9  ;;  %v1197_v5 = vsel %vm2793_vm2, %v1195_v21, %v1196_v39  ;;  %v2520_v33 = vcombine.high %v376_v37, %v491_v56  ;;  %v1550_v21 = vld [vmem:[%s3933_s2] sm:$0xff] }
  0xf8   : > { %v496_v51 = vsel %vm353_vm4, %v476_v60, %v477_v1  ;;  %1216 = vrot.lane.b32.xlu1 %v1182_v14, %s2720_s26  ;;  %2207 = vmatprep.subr.bf16.mxu0 %v2511_v18 }
  0xf9   : > { %v497_v10 = vsel %vm486_vm5, %v3072_v59, %v496_v51  ;;  %v504_v13 = vsel %vm353_vm4, %v481_v15, %v482_v19  ;;  %v610_v48 = vpop.permute.xlu0 %609  ;;  %2169 = vmatpush1.bf16.msra.mxu1 %v2517_v40  ;;  %v2519_v15 = vcombine.low %v376_v37, %v491_v56 }
  0xfa   : > { %v505_v60 = vsel %vm486_vm5, %v3085_v3, %v504_v13  ;;  %v637_v0 = vrot.slane %v610_v48, 4  ;;  %v3452_v12 = vpop.permute.xlu1 %456  ;;  %2208 = vmatpush1.bf16.msra.mxu0 %v2510_v49 }
  0xfb   : > { %536 = vst [vmem:[#allocation2 + $0x104] sm:$0x33] %v505_v60  ;;  %v478_v7 = vrot.slane %v3452_v12, 4  ;;  %1226 = vrot.lane.b32.xlu0 %v1197_v5, %s2720_s26  ;;  %2209 = vmatprep.subr.bf16.mxu0 %v2520_v33 }
  0xfc   : > { %v653_v59 = vsel %vm353_vm4, %v636_v26, %v637_v0  ;;  %1339 = vrot.lane.b32.xlu1 %v3373_v34, %s2721_s27 }
  0xfd   : > { %v654_v3 = vsel %vm651_vm7, %v3098_v25, %v653_v59  ;;  %v498_v17 = vsel %vm353_vm4, %v477_v1, %v478_v7  ;;  %v3466_v4 = vpop.permute.xlu0 %466 }
  0xfe   : > { %691 = vst [vmem:[#allocation2 + $0x104] sm:$0xcc] %v654_v3  ;;  %v499_v16 = vsel %vm486_vm5, %v455_v54, %v498_v17  ;;  %v483_v20 = vrot.slane %v3466_v4, 4  ;;  %v3471_v26 = vpop.permute.xlu1 %611  ;;  %2210 = vmatpush1.bf16.msra.mxu0 %v2519_v15 }
  0xff   : > { %v638_v34 = vrot.slane %v3471_v26, 4  ;;  %1349 = vrot.lane.b32.xlu0 %v3385_v41, %s2721_s27 }
 0x100   : > { %v506_v25 = vsel %vm353_vm4, %v482_v19, %v483_v20  ;;  %1359 = vrot.lane.b32.xlu1 %v1315_v35, %s2721_s27 }
 0x101   : > { %v507_v39 = vsel %vm486_vm5, %v465_v47, %v506_v25  ;;  %v655_v37 = vsel %vm353_vm4, %v637_v0, %v638_v34  ;;  %v620_v52 = vpop.permute.xlu0 %619 }
 0x102   : > { %537 = vst [vmem:[#allocation2 + $0x10c] sm:$0x33] %v507_v39  ;;  %v656_v41 = vsel %vm651_vm7, %v610_v48, %v655_v37  ;;  %v642_v54 = vrot.slane %v620_v52, 4  ;;  %v630_v14 = vpop.permute.xlu1 %629 }
 0x103   : > { %692 = vst [vmem:[#allocation2 + $0x10c] sm:$0xcc] %v656_v41  ;;  %v647_v56 = vrot.slane %v630_v14, 4  ;;  %1553 = vperm.xlu0 %2661, %v1550_v21   ;;  %v3961_v21 = vrot.slane %v3136_v2, 4 }
 0x104   : > { %v661_v1 = vsel %vm353_vm4, %v641_v27, %v642_v54 }
 0x105   : > { %v662_v47 = vsel %vm651_vm7, %v3111_v36, %v661_v1  ;;  %v669_v18 = vsel %vm353_vm4, %v646_v53, %v647_v56  ;;  %v3496_v19 = vpop.permute.xlu0 %621  ;;  %v1471_v40 = vld [vmem:[#allocation2 + $0x104] sm:$0xff] }
 0x106   : > { %v670_v51 = vsel %vm651_vm7, %v3122_v46, %v669_v18  ;;  %v643_v49 = vrot.slane %v3496_v19, 4  ;;  %v3501_v5 = vpop.permute.xlu1 %631  ;;  %v2527_v13 = vcombine.high %v497_v10, %v1471_v40  ;;  %v2526_v48 = vcombine.low %v497_v10, %v1471_v40 }
 0x107   : > { %v648_v27 = vrot.slane %v3501_v5, 4  ;;  %v2536_v33 = vcombine.high %v662_v47, %v670_v51  ;;  %v2535_v25 = vcombine.low %v662_v47, %v670_v51 }
 0x108   : > { %v663_v36 = vsel %vm353_vm4, %v642_v54, %v643_v49  ;;  %2170 = vmatprep.subr.bf16.mxu1 %v2527_v13 }
 0x109   : > { %v664_v53 = vsel %vm651_vm7, %v620_v52, %v663_v36  ;;  %v671_v46 = vsel %vm353_vm4, %v647_v56, %v648_v27  ;;  %v740_v60 = vpop.permute.xlu0 %739  ;;  %2171 = vmatpush1.bf16.msra.mxu1 %v2526_v48  ;;  %v3962_v52 = vrot.slane %v3151_v30, 4 }
 0x10a   : > { %v672_v0 = vsel %vm651_vm7, %v630_v14, %v671_v46  ;;  %v767_v59 = vrot.slane %v740_v60, 4  ;;  %v750_v10 = vpop.permute.xlu1 %749  ;;  %v1472_v15 = vld [vmem:[#allocation2 + $0x10c] sm:$0xff]  ;;  %2172 = vmatprep.subr.bf16.mxu1 %v2536_v33 }
 0x10b   : > { %v772_v3 = vrot.slane %v750_v10, 4  ;;  %v2528_v17 = vcombine.low %v499_v16, %v1472_v15  ;;  %v2529_v35 = vcombine.high %v499_v16, %v1472_v15  ;;  %v2538_v14 = vcombine.high %v664_v53, %v672_v0 }
 0x10c   : > { %v783_v39 = vsel %vm353_vm4, %v3961_v21, %v767_v59  ;;  %v2537_v51 = vcombine.low %v664_v53, %v672_v0  ;;  %v3964_v0 = vrot.slane %v3172_v62, 4 }
 0x10d   : > { %v784_v37 = vsel %vm781_vm8, %v3136_v2, %v783_v39  ;;  %v791_v41 = vsel %vm353_vm4, %v3962_v52, %v772_v3  ;;  %v3520_v54 = vpop.permute.xlu0 %741  ;;  %2211 = vmatprep.subr.bf16.mxu0 %v2529_v35  ;;  %2173 = vmatpush1.bf16.msra.mxu1 %v2535_v25  ;;  %v3965_v52 = vrot.slane %v3185_v28, 4 }
 0x10e   : > { %v792_v16 = vsel %vm781_vm8, %v3151_v30, %v791_v41  ;;  %v768_v56 = vrot.slane %v3520_v54, 4  ;;  %v3525_v1 = vpop.permute.xlu1 %751  ;;  %2212 = vmatpush1.bf16.msra.mxu0 %v2528_v17 }
 0x10f   : > { %v773_v47 = vrot.slane %v3525_v1, 4  ;;  %2213 = vmatprep.subr.bf16.mxu0 %v2538_v14  ;;  %v2545_v2 = vcombine.high %v784_v37, %v792_v16  ;;  %v2544_v18 = vcombine.low %v784_v37, %v792_v16 }
 0x110   : > { %v785_v40 = vsel %vm353_vm4, %v767_v59, %v768_v56  ;;  %v3963_v59 = vrot.slane %v3162_v42, 4 }
 0x111   : > { %v786_v13 = vsel %vm781_vm8, %v740_v60, %v785_v40  ;;  %v793_v30 = vsel %vm353_vm4, %v772_v3, %v773_v47  ;;  %v760_v48 = vpop.permute.xlu0 %759  ;;  %2174 = vmatprep.subr.bf16.mxu1 %v2545_v2 }
 0x112   : > { %v794_v33 = vsel %vm781_vm8, %v750_v10, %v793_v30  ;;  %v777_v36 = vrot.slane %v760_v48, 4  ;;  %v905_v46 = vpop.permute.xlu1 %904  ;;  %2214 = vmatpush1.bf16.msra.mxu0 %v2537_v51  ;;  %2175 = vmatpush1.bf16.msra.mxu1 %v2544_v18 }
 0x113   : > { %v932_v15 = vrot.slane %v905_v46, 4  ;;  %v2546_v17 = vcombine.low %v786_v13, %v794_v33  ;;  %v2547_v35 = vcombine.high %v786_v13, %v794_v33 }
 0x114   : > { %v799_v53 = vsel %vm353_vm4, %v3963_v59, %v777_v36 }
 0x115   : > { %v800_v60 = vsel %vm781_vm8, %v3162_v42, %v799_v53  ;;  %v948_v3 = vsel %vm353_vm4, %v3964_v0, %v932_v15  ;;  %v915_v25 = vpop.permute.xlu0 %914  ;;  %2215 = vmatprep.subr.bf16.mxu0 %v2547_v35  ;;  %v3967_v0 = vrot.slane %v3212_v61, 4 }
 0x116   : > { %831 = vst [vmem:[#allocation2 + $0x1b8] sm:$0x33] %v800_v60  ;;  %v949_v10 = vsel %vm946_vm9, %v3172_v62, %v948_v3  ;;  %v937_v21 = vrot.slane %v915_v25, 4  ;;  %v3546_v39 = vpop.permute.xlu1 %761  ;;  %2216 = vmatpush1.bf16.msra.mxu0 %v2546_v17  ;;  %v3966_v60 = vrot.slane %v3199_v45, 4 }
 0x117   : > { %986 = vst [vmem:[#allocation2 + $0x1b8] sm:$0xcc] %v949_v10  ;;  %v778_v37 = vrot.slane %v3546_v39, 4 }
 0x118   : > { %v956_v42 = vsel %vm353_vm4, %v3965_v52, %v937_v21 }
 0x119   : > { %v957_v41 = vsel %vm946_vm9, %v3185_v28, %v956_v42  ;;  %v801_v14 = vsel %vm353_vm4, %v777_v36, %v778_v37  ;;  %v3557_v16 = vpop.permute.xlu0 %906 }
 0x11a   : > { %v802_v62 = vsel %vm781_vm8, %v760_v48, %v801_v14  ;;  %v933_v2 = vrot.slane %v3557_v16, 4  ;;  %v3561_v18 = vpop.permute.xlu1 %916 }
 0x11b   : > { %832 = vst [vmem:[#allocation2 + $0x1c0] sm:$0x33] %v802_v62  ;;  %v938_v40 = vrot.slane %v3561_v18, 4 }
 0x11c   : > { %v950_v51 = vsel %vm353_vm4, %v932_v15, %v933_v2 }
 0x11d   : > { %v951_v28 = vsel %vm946_vm9, %v905_v46, %v950_v51  ;;  %v958_v13 = vsel %vm353_vm4, %v937_v21, %v938_v40  ;;  %v925_v30 = vpop.permute.xlu0 %924 }
 0x11e   : > { %987 = vst [vmem:[#allocation2 + $0x1c0] sm:$0xcc] %v951_v28  ;;  %v959_v48 = vsel %vm946_vm9, %v915_v25, %v958_v13  ;;  %v942_v33 = vrot.slane %v925_v30, 4  ;;  %v1035_v36 = vpop.permute.xlu1 %1034  ;;  %v1496_v17 = vld [vmem:[#allocation2 + $0x1b8] sm:$0xff] }
 0x11f   : > { %v1062_v35 = vrot.slane %v1035_v36, 4  ;;  %v2554_v59 = vcombine.high %v1496_v17, %v957_v41  ;;  %v2553_v53 = vcombine.low %v1496_v17, %v957_v41 }
 0x120   : > { %v964_v15 = vsel %vm353_vm4, %v3966_v60, %v942_v33 }
 0x121   : > { %v965_v46 = vsel %vm946_vm9, %v3199_v45, %v964_v15  ;;  %v1078_v3 = vsel %vm353_vm4, %v3967_v0, %v1062_v35  ;;  %v3580_v10 = vpop.permute.xlu0 %926  ;;  %2176 = vmatprep.subr.bf16.mxu1 %v2554_v59  ;;  %v3969_v0 = vrot.slane %v3239_v6, 4 }
 0x122   : > { %v1079_v25 = vsel %vm1076_vm10, %v3212_v61, %v1078_v3  ;;  %v3958_v21 = vrot.slane %v3580_v10, 4  ;;  %v3585_v52 = vpop.permute.xlu1 %1036  ;;  %2177 = vmatpush1.bf16.msra.mxu1 %v2553_v53 }
 0x123   : > { %v3957_v42 = vrot.slane %v3585_v52, 4  ;;  %v2563_v41 = vcombine.high %v965_v46, %v1079_v25  ;;  %v2562_v14 = vcombine.low %v965_v46, %v1079_v25 }
 0x124   : > { %v966_v45 = vsel %vm353_vm4, %v942_v33, %v3958_v21  ;;  %v3968_v33 = vrot.slane %v3222_v24, 4 }
 0x125   : > { %v967_v62 = vsel %vm946_vm9, %v925_v30, %v966_v45  ;;  %v1080_v51 = vsel %vm353_vm4, %v1062_v35, %v3957_v42  ;;  %v1045_v61 = vpop.permute.xlu0 %1044  ;;  %v1497_v28 = vld [vmem:[#allocation2 + $0x1c0] sm:$0xff]  ;;  %2178 = vmatprep.subr.bf16.mxu1 %v2563_v41 }
 0x126   : > { %v1081_v13 = vsel %vm1076_vm10, %v1035_v36, %v1080_v51  ;;  %v1067_v17 = vrot.slane %v1045_v61, 4  ;;  %v1055_v59 = vpop.permute.xlu1 %1054  ;;  %v2555_v53 = vcombine.low %v1497_v28, %v959_v48  ;;  %v2556_v60 = vcombine.high %v1497_v28, %v959_v48  ;;  %2179 = vmatpush1.bf16.msra.mxu1 %v2562_v14 }
 0x127   : > { %v1072_v15 = vrot.slane %v1055_v59, 4  ;;  %v2565_v46 = vcombine.high %v967_v62, %v1081_v13  ;;  %v2564_v45 = vcombine.low %v967_v62, %v1081_v13  ;;  %v3970_v51 = vrot.slane %v3256_v32, 4 }
 0x128   : > { %v1087_v30 = vsel %vm353_vm4, %v3968_v33, %v1067_v17  ;;  %2217 = vmatprep.subr.bf16.mxu0 %v2556_v60 }
 0x129   : > { %v1088_v35 = vsel %vm1076_vm10, %v3222_v24, %v1087_v30  ;;  %v1096_v3 = vsel %vm353_vm4, %v3969_v0, %v1072_v15  ;;  %v1203_v36 = vpop.permute.xlu0 %1202  ;;  %2218 = vmatpush1.bf16.msra.mxu0 %v2555_v53 }
 0x12a   : > { %v1097_v48 = vsel %vm1076_vm10, %v3239_v6, %v1096_v3  ;;  %v1230_v25 = vrot.slane %v1203_v36, 4  ;;  %v3606_v41 = vpop.permute.xlu1 %1046  ;;  %2219 = vmatprep.subr.bf16.mxu0 %v2565_v46 }
 0x12b   : > { %1129 = vst [vmem:[#allocation2 + $0x26c] sm:$0x33] %v1097_v48  ;;  %v3956_v14 = vrot.slane %v3606_v41, 4 }
 0x12c   : > { %v1246_v24 = vsel %vm353_vm4, %v3970_v51, %v1230_v25 }
 0x12d   : > { %v1247_v28 = vsel %vm1244_vm13, %v3256_v32, %v1246_v24  ;;  %v1089_v53 = vsel %vm353_vm4, %v1067_v17, %v3956_v14  ;;  %v3617_v6 = vpop.permute.xlu0 %1056  ;;  %2220 = vmatpush1.bf16.msra.mxu0 %v2564_v45  ;;  %v3971_v45 = vrot.slane %v3269_v23, 4 }
 0x12e   : > { %1287 = vst [vmem:[#allocation2 + $0x26c] sm:$0xcc] %v1247_v28  ;;  %v1090_v60 = vsel %vm1076_vm10, %v1045_v61, %v1089_v53  ;;  %v3955_v46 = vrot.slane %v3617_v6, 4  ;;  %v3621_v62 = vpop.permute.xlu1 %1204 }
 0x12f   : > { %v3954_v13 = vrot.slane %v3621_v62, 4 }
 0x130   : > { %v1098_v32 = vsel %vm353_vm4, %v1072_v15, %v3955_v46 }
 0x131   : > { %v1099_v33 = vsel %vm1076_vm10, %v1055_v59, %v1098_v32  ;;  %v1248_v17 = vsel %vm353_vm4, %v1230_v25, %v3954_v13  ;;  %v1213_v30 = vpop.permute.xlu0 %1212  ;;  %v3972_v59 = vrot.slane %v3293_v58, 4 }
 0x132   : > { %1130 = vst [vmem:[#allocation2 + $0x274] sm:$0x33] %v1099_v33  ;;  %v1249_v61 = vsel %vm1244_vm13, %v1203_v36, %v1248_v17  ;;  %v1235_v0 = vrot.slane %v1213_v30, 4  ;;  %v1223_v3 = vpop.permute.xlu1 %1222 }
 0x133   : > { %1288 = vst [vmem:[#allocation2 + $0x274] sm:$0xcc] %v1249_v61  ;;  %v1240_v48 = vrot.slane %v1223_v3, 4 }
 0x134   : > { %v1255_v51 = vsel %vm353_vm4, %v3971_v45, %v1235_v0 }
 0x135   : > { %v1256_v15 = vsel %vm1244_vm13, %v3269_v23, %v1255_v51  ;;  %v1264_v24 = vsel %vm353_vm4, %v3972_v59, %v1240_v48  ;;  %v3640_v25 = vpop.permute.xlu0 %1214  ;;  %v1521_v28 = vld [vmem:[#allocation2 + $0x26c] sm:$0xff] }
 0x136   : > { %v1265_v36 = vsel %vm1244_vm13, %v3293_v58, %v1264_v24  ;;  %v1236_v53 = vrot.slane %v3640_v25, 4  ;;  %v3645_v32 = vpop.permute.xlu1 %1224  ;;  %v2572_v33 = vcombine.high %v1088_v35, %v1521_v28  ;;  %v2571_v17 = vcombine.low %v1088_v35, %v1521_v28 }
 0x137   : > { %v1241_v61 = vrot.slane %v3645_v32, 4  ;;  %v2581_v45 = vcombine.high %v1256_v15, %v1265_v36  ;;  %v2580_v21 = vcombine.low %v1256_v15, %v1265_v36 }
 0x138   : > { %v1257_v23 = vsel %vm353_vm4, %v1235_v0, %v1236_v53  ;;  %2180 = vmatprep.subr.bf16.mxu1 %v2572_v33  ;;  %v3973_v0 = vrot.slane %v3306_v55, 4 }
 0x139   : > { %v1258_v51 = vsel %vm1244_vm13, %v1213_v30, %v1257_v23  ;;  %v1266_v58 = vsel %vm353_vm4, %v1240_v48, %v1241_v61  ;;  %v1336_v59 = vpop.permute.xlu0 %1335  ;;  %2181 = vmatpush1.bf16.msra.mxu1 %v2571_v17  ;;  %v3974_v48 = vrot.slane %v3319_v44, 4 }
 0x13a   : > { %v1267_v24 = vsel %vm1244_vm13, %v1223_v3, %v1266_v58  ;;  %v1363_v13 = vrot.slane %v1336_v59, 4  ;;  %v1346_v35 = vpop.permute.xlu1 %1345  ;;  %v1522_v28 = vld [vmem:[#allocation2 + $0x274] sm:$0xff]  ;;  %2182 = vmatprep.subr.bf16.mxu1 %v2581_v45 }
 0x13b   : > { %v1368_v46 = vrot.slane %v1346_v35, 4  ;;  %v2573_v14 = vcombine.low %v1090_v60, %v1522_v28  ;;  %v2574_v42 = vcombine.high %v1090_v60, %v1522_v28  ;;  %v2583_v45 = vcombine.high %v1258_v51, %v1267_v24 }
 0x13c   : > { %v1379_v30 = vsel %vm353_vm4, %v3973_v0, %v1363_v13 }
 0x13d   : > { %v1380_v33 = vsel %vm1377_vm14, %v3306_v55, %v1379_v30  ;;  %v1388_v17 = vsel %vm353_vm4, %v3974_v48, %v1368_v46  ;;  %v3664_v3 = vpop.permute.xlu0 %1337  ;;  %2221 = vmatprep.subr.bf16.mxu0 %v2574_v42  ;;  %2183 = vmatpush1.bf16.msra.mxu1 %v2580_v21  ;;  %v2582_v42 = vcombine.low %v1258_v51, %v1267_v24 }
 0x13e   : > { %v1389_v60 = vsel %vm1377_vm14, %v3319_v44, %v1388_v17  ;;  %v1364_v15 = vrot.slane %v3664_v3, 4  ;;  %v3669_v36 = vpop.permute.xlu1 %1347  ;;  %2222 = vmatpush1.bf16.msra.mxu0 %v2573_v14 }
 0x13f   : > { %v1369_v23 = vrot.slane %v3669_v36, 4  ;;  %2223 = vmatprep.subr.bf16.mxu0 %v2583_v45  ;;  %v2590_v55 = vcombine.high %v1380_v33, %v1389_v60  ;;  %v2589_v58 = vcombine.low %v1380_v33, %v1389_v60 }
 0x140   : > { %v1381_v28 = vsel %vm353_vm4, %v1363_v13, %v1364_v15 }
 0x141   : > { %v1382_v21 = vsel %vm1377_vm14, %v1336_v59, %v1381_v28  ;;  %v1390_v44 = vsel %vm353_vm4, %v1368_v46, %v1369_v23  ;;  %v1356_v0 = vpop.permute.xlu0 %1355  ;;  %2184 = vmatprep.subr.bf16.mxu1 %v2590_v55  ;;  %v3975_v59 = vrot.slane %v3333_v50, 4 }
 0x142   : > { %v1391_v14 = vsel %vm1377_vm14, %v1346_v35, %v1390_v44  ;;  %v1373_v30 = vrot.slane %v1356_v0, 4  ;;  %v3680_v48 = vpop.permute.xlu1 %1357  ;;  %2224 = vmatpush1.bf16.msra.mxu0 %v2582_v42  ;;  %2185 = vmatpush1.bf16.msra.mxu1 %v2589_v58 }
 0x143   : > { %v1374_v33 = vrot.slane %v3680_v48, 4  ;;  %v2591_v13 = vcombine.low %v1382_v21, %v1391_v14  ;;  %v2592_v51 = vcombine.high %v1382_v21, %v1391_v14  ;;  %v3977_v21 = vrot.slane %v3362_v43, 4 }
 0x144   : > { %v1397_v24 = vsel %vm353_vm4, %v3975_v59, %v1373_v30 }
 0x145   : > { %v1398_v46 = vsel %vm1377_vm14, %v3333_v50, %v1397_v24  ;;  %v1399_v35 = vsel %vm353_vm4, %v1373_v30, %v1374_v33  ;;  %v317_v17 = vpop.permute.xlu0 %316  ;;  %2225 = vmatprep.subr.bf16.mxu0 %v2592_v51  ;;  %v3976_v50 = vrot.slane %v3355_v8, 4 }
 0x146   : > { %1430 = vst [vmem:[#allocation2 + $0x320] sm:$0x33] %v1398_v46  ;;  %v1400_v45 = vsel %vm1377_vm14, %v1356_v0, %v1399_v35  ;;  %v342_v60 = vrot.slane %v317_v17, 4  ;;  %399 = vst.msk [vmem:[#allocation2 + $0x68] sm:$0xc] %vm398_vm15, %v317_v17  ;;  %v327_v55 = vpop.permute.xlu1 %326  ;;  %2226 = vmatpush1.bf16.msra.mxu0 %v2591_v13 }
 0x147   : > { %1431 = vst [vmem:[#allocation2 + $0x328] sm:$0x33] %v1400_v45  ;;  %v347_v58 = vrot.slane %v327_v55, 4  ;;  %404 = vst.msk [vmem:[#allocation2 + $0x8c] sm:$0xf] %vm227_vm12, %v327_v55 }
 0x148   : > { %v361_v28 = vsel %vm353_vm4, %v3976_v50, %v342_v60 }
 0x149   : > { %v362_v42 = vsel %vm355_vm6, %v3355_v8, %v361_v28  ;;  %v369_v44 = vsel %vm353_vm4, %v3977_v21, %v347_v58  ;;  %v337_v0 = vpop.permute.xlu0 %336 }
 0x14a   : > { %397 = vst [vmem:[#allocation2 + $0x60] sm:$0xcc] %v362_v42  ;;  %v3704_v14 = vsel %vm355_vm6, %v3362_v43, %v369_v44  ;;  %v352_v30 = vrot.slane %v337_v0, 4  ;;  %409 = vst.msk [vmem:[#allocation2 + $0xb0] sm:$0xf] %vm227_vm12, %v337_v0  ;;  %v449_v13 = vpop.permute.xlu1 %448 }
 0x14b   : > { %v474_v51 = vrot.slane %v449_v13, 4  ;;  %529 = vst.msk [vmem:[#allocation2 + $0xd4] sm:$0xf] %vm227_vm12, %v449_v13 }
 0x14c   : > { %v377_v8 = vsel %vm353_vm4, %v351_v11, %v352_v30 }
 0x14d   : > { %v3713_v59 = vsel %vm355_vm6, %v3403_v38, %v377_v8  ;;  %v492_v43 = vsel %vm353_vm4, %v473_v22, %v474_v51  ;;  %v459_v24 = vpop.permute.xlu0 %458  ;;  %v1546_v46 = vld [vmem:[#allocation2 + $0x320] sm:$0x33]  ;;  %v3979_v8 = vmov 0  }
 0x14e   : > { %v3720_v35 = vsel %vm486_vm5, %v3411_v31, %v492_v43  ;;  %v479_v17 = vrot.slane %v459_v24, 4  ;;  %534 = vst.msk [vmem:[#allocation2 + $0xf8] sm:$0xf] %vm227_vm12, %v459_v24  ;;  %v469_v45 = vpop.permute.xlu1 %468  ;;  %v2599_v60 = vcombine.high %v1546_v46, %v1546_v46  ;;  %v2598_v11 = vcombine.low %v1546_v46, %v1546_v46  ;;  %v1547_v55 = vld [vmem:[#allocation2 + $0x328] sm:$0x33] }
 0x14f   : > { %v484_v58 = vrot.slane %v469_v45, 4  ;;  %539 = vst.msk [vmem:[#allocation2 + $0x11c] sm:$0x3] %vm238_vm11, %v469_v45  ;;  %v2601_v38 = vcombine.high %v1547_v55, %v1547_v55  ;;  %v2600_v50 = vcombine.low %v1547_v55, %v1547_v55  ;;  %v3980_v45 = vcombine.low %v3273_v29, %v3276_v63 }
 0x150   : > { %v500_v22 = vsel %vm353_vm4, %v478_v7, %v479_v17  ;;  %2607 = vmatprep.subr.msk.bf16.mxu1 %vm270_vm0, %v2599_v60  ;;  %v2103_v31 = vsel %vm270_vm0, %v2598_v11, 0 }
 0x151   : > { %v3731_v28 = vsel %vm486_vm5, %v3452_v12, %v500_v22  ;;  %v508_v42 = vsel %vm353_vm4, %v483_v20, %v484_v58  ;;  %v614_v21 = vpop.permute.xlu0 %613  ;;  %2187 = vmatpush1.bf16.msra.mxu1 %v2103_v31  ;;  %2609 = vmatprep.subr.msk.bf16.mxu0 %vm270_vm0, %v2601_v38  ;;  %v2109_v44 = vsel %vm270_vm0, %v2600_v50, 0  ;;  %v1448_v0 = vld [vmem:[#allocation2 + $0x60] sm:$0xff]  ;;  %v3978_v12 = vcombine.high %v3273_v29, %v3276_v63 }
 0x152   : > { %v509_v7 = vsel %vm486_vm5, %v3466_v4, %v508_v42  ;;  %v639_v30 = vrot.slane %v614_v21, 4  ;;  %694 = vst.msk [vmem:[#allocation2 + $0x11c] sm:$0xc] %vm398_vm15, %v614_v21  ;;  %v624_v13 = vpop.permute.xlu1 %623  ;;  %2228 = vmatpush1.bf16.msra.mxu0 %v2109_v44  ;;  %v2676_v20 = vld [vmem:[#allocation2 + $0x20] ss:$36 sps:$4 sm:$0xff]   ;;  %v2513_v43 = vcombine.high %v1448_v0, %v3704_v14  ;;  %v2522_v63 = vcombine.high %v3713_v59, %v3720_v35 }
 0x153   : > { %2246 = vmatprep.subr.bf16.mxu1 %v3978_v12  ;;  %538 = vst [vmem:[#allocation2 + $0x114] sm:$0x33] %v509_v7  ;;  %v644_v51 = vrot.slane %v624_v13, 4  ;;  %699 = vst.msk [vmem:[#allocation2 + $0x140] sm:$0xf] %vm227_vm12, %v624_v13  ;;  %2287 = vmatprep.subr.bf16.mxu0 %v3979_v8 }
 0x154   : > { %v657_v4 = vsel %vm353_vm4, %v638_v34, %v639_v30  ;;  %2197 = vmatmul.mubr.bf16.vlgmr.msra.gmra.mrb[0].mxu1 %v3395_v57 }
 0x155   : > { %v658_v24 = vsel %vm651_vm7, %v3471_v26, %v657_v4  ;;  %v665_v46 = vsel %vm353_vm4, %v643_v49, %v644_v51  ;;  %v634_v17 = vpop.permute.xlu0 %633  ;;  %2247 = vmatpush1.bf16.msra.mxu1 %v3980_v45  ;;  %2238 = vmatmul.mubr.bf16.vlgmr.msra.gmra.mrb[4].mxu0 %v3395_v57  ;;  %v2512_v49 = vcombine.low %v1448_v0, %v3704_v14 }
 0x156   : > { %693 = vst [vmem:[#allocation2 + $0x114] sm:$0xcc] %v658_v24  ;;  %v3762_v34 = vsel %vm651_vm7, %v3496_v19, %v665_v46  ;;  %v649_v60 = vrot.slane %v634_v17, 4  ;;  %704 = vst.msk [vmem:[#allocation2 + $0x164] sm:$0xf] %vm227_vm12, %v634_v17  ;;  %v744_v26 = vpop.permute.xlu1 %743  ;;  %2248 = vmatprep.subr.bf16.mxu1 %v2513_v43  ;;  %2288 = vmatpush1.bf16.msra.mxu0 %v2676_v20  ;;  %v3982_v46 = vrot.slane %v3585_v52, 4 }
 0x157   : > { %v769_v11 = vrot.slane %v744_v26, 4  ;;  %824 = vst.msk [vmem:[#allocation2 + $0x188] sm:$0xf] %vm227_vm12, %v744_v26  ;;  %2289 = vmatprep.subr.bf16.mxu0 %v3979_v8  ;;  %2613 = vmatprep.mubr.msk.bf16.mxu0 %vm2091_vm3, %v2980_v9  ;;  %v2677_v19 = vld [vmem:[#allocation2 + $0x68] ss:$36 sps:$4 sm:$0xff]  }
 0x158   : > { %v673_v29 = vsel %vm353_vm4, %v648_v27, %v649_v60  ;;  %2612 = vmatprep.mubr.msk.bf16.mxu1 %vm2091_vm3, %v2980_v9 }
 0x159   : > { %v674_v55 = vsel %vm651_vm7, %v3501_v5, %v673_v29  ;;  %v787_v14 = vsel %vm353_vm4, %v768_v56, %v769_v11  ;;  %v754_v58 = vpop.permute.xlu0 %753  ;;  %2249 = vmatpush1.bf16.msra.mxu1 %v2512_v49  ;;  %v2521_v5 = vcombine.low %v3713_v59, %v3720_v35 }
 0x15a   : > { %v3784_v38 = vsel %vm781_vm8, %v3520_v54, %v787_v14  ;;  %v774_v27 = vrot.slane %v754_v58, 4  ;;  %829 = vst.msk [vmem:[#allocation2 + $0x1ac] sm:$0xf] %vm227_vm12, %v754_v58  ;;  %v764_v50 = vpop.permute.xlu1 %763  ;;  %2250 = vmatprep.subr.bf16.mxu1 %v2522_v63  ;;  %2290 = vmatpush1.bf16.msra.mxu0 %v2677_v19  ;;  %v2678_v54 = vld [vmem:[#allocation2 + $0xb0] ss:$36 sps:$4 sm:$0xff]   ;;  %v2540_v7 = vcombine.high %v3762_v34, %v674_v55  ;;  %v3983_v19 = vrot.slane %v3606_v41, 4 }
 0x15b   : > { %v779_v9 = vrot.slane %v764_v50, 4  ;;  %834 = vst.msk [vmem:[#allocation2 + $0x1d0] sm:$0x3] %vm238_vm11, %v764_v50  ;;  %2291 = vmatprep.subr.bf16.mxu0 %v3979_v8  ;;  %v2539_v4 = vcombine.low %v3762_v34, %v674_v55 }
 0x15c   : > { %v795_v56 = vsel %vm353_vm4, %v773_v47, %v774_v27 }
 0x15d   : > { %v796_v22 = vsel %vm781_vm8, %v3525_v1, %v795_v56  ;;  %v803_v31 = vsel %vm353_vm4, %v778_v37, %v779_v9  ;;  %v909_v42 = vpop.permute.xlu0 %908  ;;  %2251 = vmatpush1.bf16.msra.mxu1 %v2521_v5  ;;  %v1473_v21 = vld [vmem:[#allocation2 + $0x114] sm:$0xff]  ;;  %v2680_v43 = vld [vmem:[#allocation2 + $0x140] ss:$36 sps:$4 sm:$0xff]  }
 0x15e   : > { %v804_v59 = vsel %vm781_vm8, %v3546_v39, %v803_v31  ;;  %v934_v35 = vrot.slane %v909_v42, 4  ;;  %989 = vst.msk [vmem:[#allocation2 + $0x1d0] sm:$0xc] %vm398_vm15, %v909_v42  ;;  %v919_v44 = vpop.permute.xlu1 %918  ;;  %2292 = vmatpush1.bf16.msra.mxu0 %v2678_v54  ;;  %v2530_v47 = vcombine.low %v3731_v28, %v1473_v21  ;;  %v2531_v0 = vcombine.high %v3731_v28, %v1473_v21  ;;  %v2679_v39 = vld [vmem:[#allocation2 + $0xf8] ss:$36 sps:$4 sm:$0xff]  }
 0x15f   : > { %833 = vst [vmem:[#allocation2 + $0x1c8] sm:$0x33] %v804_v59  ;;  %v939_v1 = vrot.slane %v919_v44, 4  ;;  %994 = vst.msk [vmem:[#allocation2 + $0x1f4] sm:$0xf] %vm227_vm12, %v919_v44  ;;  %2293 = vmatprep.subr.bf16.mxu0 %v3979_v8  ;;  %v2549_v24 = vcombine.high %v3784_v38, %v796_v22  ;;  %v3985_v21 = vrot.slane %v3621_v62, 4 }
 0x160   : > { %v952_v37 = vsel %vm353_vm4, %v933_v2, %v934_v35  ;;  %2252 = vmatprep.subr.bf16.mxu1 %v2531_v0 }
 0x161   : > { %v953_v30 = vsel %vm946_vm9, %v3557_v16, %v952_v37  ;;  %v960_v28 = vsel %vm353_vm4, %v938_v40, %v939_v1  ;;  %v929_v13 = vpop.permute.xlu0 %928  ;;  %2253 = vmatpush1.bf16.msra.mxu1 %v2530_v47  ;;  %v3981_v16 = vrot.slane %v3580_v10, 4  ;;  %v2681_v14 = vld [vmem:[#allocation2 + $0x188] ss:$36 sps:$4 sm:$0xff]  }
 0x162   : > { %988 = vst [vmem:[#allocation2 + $0x1c8] sm:$0xcc] %v953_v30  ;;  %v961_v12 = vsel %vm946_vm9, %v3561_v18, %v960_v28  ;;  %v944_v20 = vrot.slane %v929_v13, 4  ;;  %999 = vst.msk [vmem:[#allocation2 + $0x218] sm:$0xf] %vm227_vm12, %v929_v13  ;;  %v1039_v2 = vpop.permute.xlu1 %1038  ;;  %2294 = vmatpush1.bf16.msra.mxu0 %v2679_v39  ;;  %2254 = vmatprep.subr.bf16.mxu1 %v2540_v7 }
 0x163   : > { %v1064_v51 = vrot.slane %v1039_v2, 4  ;;  %2295 = vmatprep.subr.bf16.mxu0 %v3979_v8 }
 0x164   : > { %v968_v40 = vsel %vm353_vm4, %v3981_v16, %v944_v20 }
 0x165   : > { %v3826_v18 = vsel %vm946_vm9, %v3580_v10, %v968_v40  ;;  %v1082_v17 = vsel %vm353_vm4, %v3982_v46, %v1064_v51  ;;  %v1084_v45 = vsel %vm1076_vm10, %v1039_v2, %v1064_v51  ;;  %v1049_v34 = vpop.permute.xlu0 %1048  ;;  %2255 = vmatpush1.bf16.msra.mxu1 %v2539_v4  ;;  %v2548_v10 = vcombine.low %v3784_v38, %v796_v22 }
 0x166   : > { %v1083_v60 = vsel %vm1076_vm10, %v3585_v52, %v1082_v17  ;;  %1122 = vst.msk [vmem:[#allocation2 + $0x23c] sm:$0xf] %vm227_vm12, %v1084_v45  ;;  %v1069_v26 = vrot.slane %v1049_v34, 4  ;;  %v1059_v11 = vpop.permute.xlu1 %1058  ;;  %2296 = vmatpush1.bf16.msra.mxu0 %v2680_v43  ;;  %2256 = vmatprep.subr.bf16.mxu1 %v2549_v24  ;;  %v3984_v38 = vrot.slane %v3617_v6, 4  ;;  %v2682_v44 = vld [vmem:[#allocation2 + $0x1d0] ss:$36 sps:$4 sm:$0xff]  }
 0x167   : > { %v1074_v49 = vrot.slane %v1059_v11, 4  ;;  %2297 = vmatprep.subr.bf16.mxu0 %v3979_v8  ;;  %v2566_v29 = vcombine.low %v3826_v18, %v1083_v60  ;;  %v2567_v63 = vcombine.high %v3826_v18, %v1083_v60 }
 0x168   : > { %v1091_v55 = vsel %vm353_vm4, %v3983_v19, %v1069_v26  ;;  %v1093_v52 = vsel %vm1076_vm10, %v1049_v34, %v1069_v26 }
 0x169   : > { %v3845_v58 = vsel %vm1076_vm10, %v3606_v41, %v1091_v55  ;;  %1127 = vst.msk [vmem:[#allocation2 + $0x260] sm:$0xf] %vm227_vm12, %v1093_v52  ;;  %v1100_v27 = vsel %vm353_vm4, %v3984_v38, %v1074_v49  ;;  %v1102_v50 = vsel %vm1076_vm10, %v1059_v11, %v1074_v49  ;;  %v1207_v9 = vpop.permute.xlu0 %1206  ;;  %2257 = vmatpush1.bf16.msra.mxu1 %v2548_v10  ;;  %v1498_v5 = vld [vmem:[#allocation2 + $0x1c8] sm:$0xff] }
 0x16a   : > { %v1101_v56 = vsel %vm1076_vm10, %v3617_v6, %v1100_v27  ;;  %1132 = vst.msk [vmem:[#allocation2 + $0x284] sm:$0x3] %vm238_vm11, %v1102_v50  ;;  %v1232_v54 = vrot.slane %v1207_v9, 4  ;;  %v1217_v22 = vpop.permute.xlu1 %1216  ;;  %2298 = vmatpush1.bf16.msra.mxu0 %v2681_v14  ;;  %v2557_v41 = vcombine.low %v1498_v5, %v961_v12  ;;  %v2558_v31 = vcombine.high %v1498_v5, %v961_v12 }
 0x16b   : > { %1131 = vst [vmem:[#allocation2 + $0x27c] sm:$0x33] %v1101_v56  ;;  %v1237_v42 = vrot.slane %v1217_v22, 4  ;;  %2299 = vmatprep.subr.bf16.mxu0 %v3979_v8 }
 0x16c   : > { %v1250_v59 = vsel %vm353_vm4, %v3985_v21, %v1232_v54  ;;  %v1252_v35 = vsel %vm1244_vm13, %v1207_v9, %v1232_v54  ;;  %2258 = vmatprep.subr.bf16.mxu1 %v2558_v31 }
 0x16d   : > { %v1251_v6 = vsel %vm1244_vm13, %v3621_v62, %v1250_v59  ;;  %1290 = vst.msk [vmem:[#allocation2 + $0x284] sm:$0xc] %vm398_vm15, %v1252_v35  ;;  %v1259_v47 = vsel %vm353_vm4, %v1236_v53, %v1237_v42  ;;  %v1261_v0 = vsel %vm1244_vm13, %v1217_v22, %v1237_v42  ;;  %v1227_v1 = vpop.permute.xlu0 %1226  ;;  %2259 = vmatpush1.bf16.msra.mxu1 %v2557_v41  ;;  %v2683_v28 = vld [vmem:[#allocation2 + $0x218] ss:$36 sps:$4 sm:$0xff]  }
 0x16e   : > { %1289 = vst [vmem:[#allocation2 + $0x27c] sm:$0xcc] %v1251_v6  ;;  %v1260_v37 = vsel %vm1244_vm13, %v3640_v25, %v1259_v47  ;;  %1295 = vst.msk [vmem:[#allocation2 + $0x2a8] sm:$0xf] %vm227_vm12, %v1261_v0  ;;  %v1242_v39 = vrot.slane %v1227_v1, 4  ;;  %v1340_v7 = vpop.permute.xlu1 %1339  ;;  %2300 = vmatpush1.bf16.msra.mxu0 %v2682_v44  ;;  %2260 = vmatprep.subr.bf16.mxu1 %v2567_v63 }
 0x16f   : > { %v1365_v62 = vrot.slane %v1340_v7, 4  ;;  %2301 = vmatprep.subr.bf16.mxu0 %v3979_v8 }
 0x170   : > { %v1268_v53 = vsel %vm353_vm4, %v1241_v61, %v1242_v39  ;;  %v1270_v30 = vsel %vm1244_vm13, %v1227_v1, %v1242_v39 }
 0x171   : > { %v1269_v13 = vsel %vm1244_vm13, %v3645_v32, %v1268_v53  ;;  %1300 = vst.msk [vmem:[#allocation2 + $0x2cc] sm:$0xf] %vm227_vm12, %v1270_v30  ;;  %v1383_v25 = vsel %vm353_vm4, %v1364_v15, %v1365_v62  ;;  %v1385_v12 = vsel %vm1377_vm14, %v1340_v7, %v1365_v62  ;;  %v1350_v20 = vpop.permute.xlu0 %1349  ;;  %2261 = vmatpush1.bf16.msra.mxu1 %v2566_v29 }
 0x172   : > { %v1384_v2 = vsel %vm1377_vm14, %v3664_v3, %v1383_v25  ;;  %1423 = vst.msk [vmem:[#allocation2 + $0x2f0] sm:$0xf] %vm227_vm12, %v1385_v12  ;;  %v1370_v61 = vrot.slane %v1350_v20, 4  ;;  %v1360_v51 = vpop.permute.xlu1 %1359  ;;  %2302 = vmatpush1.bf16.msra.mxu0 %v2683_v28  ;;  %v2585_v17 = vcombine.high %v1260_v37, %v1269_v13 }
 0x173   : > { %v1375_v4 = vrot.slane %v1360_v51, 4  ;;  %2303 = vmatprep.subr.bf16.mxu0 %v3979_v8 }
 0x174   : > { %v1392_v32 = vsel %vm353_vm4, %v1369_v23, %v1370_v61  ;;  %v1394_v15 = vsel %vm1377_vm14, %v1350_v20, %v1370_v61  ;;  %v2684_v16 = vld [vmem:[#allocation2 + $0x260] ss:$36 sps:$4 sm:$0xff]  }
 0x175   : > { %v1393_v40 = vsel %vm1377_vm14, %v3669_v36, %v1392_v32  ;;  %1428 = vst.msk [vmem:[#allocation2 + $0x314] sm:$0xf] %vm227_vm12, %v1394_v15  ;;  %v1401_v3 = vsel %vm353_vm4, %v1374_v33, %v1375_v4  ;;  %v1403_v43 = vsel %vm1377_vm14, %v1360_v51, %v1375_v4  ;;  %v1523_v24 = vld [vmem:[#allocation2 + $0x27c] sm:$0xff]  ;;  %v2584_v33 = vcombine.low %v1260_v37, %v1269_v13 }
 0x176   : > { %v1402_v18 = vsel %vm1377_vm14, %v3680_v48, %v1401_v3  ;;  %1433 = vst.msk [vmem:[#allocation2 + $0x338] sm:$0x3] %vm238_vm11, %v1403_v43  ;;  %2304 = vmatpush1.bf16.msra.mxu0 %v2684_v16  ;;  %v2575_v23 = vcombine.low %v3845_v58, %v1523_v24  ;;  %v2576_v46 = vcombine.high %v3845_v58, %v1523_v24 }
 0x177   : > { %1432 = vst [vmem:[#allocation2 + $0x330] sm:$0x33] %v1402_v18  ;;  %2305 = vmatprep.subr.bf16.mxu0 %v3979_v8  ;;  %v2594_v45 = vcombine.high %v1384_v2, %v1393_v40  ;;  %v2593_v26 = vcombine.low %v1384_v2, %v1393_v40 }
 0x178   : > { %2262 = vmatprep.subr.bf16.mxu1 %v2576_v46  ;;  %v2685_v36 = vld [vmem:[#allocation2 + $0x2a8] ss:$36 sps:$4 sm:$0xff]  }
 0x179   : > { %2263 = vmatpush1.bf16.msra.mxu1 %v2575_v23 }
 0x17a   : > { %2306 = vmatpush1.bf16.msra.mxu0 %v2685_v36  ;;  %2264 = vmatprep.subr.bf16.mxu1 %v2585_v17 }
 0x17b   : > { %2307 = vmatprep.subr.bf16.mxu0 %v3979_v8 }
 0x17c   : > { %v2686_v48 = vld [vmem:[#allocation2 + $0x2f0] ss:$36 sps:$4 sm:$0xff]  }
 0x17d   : > { %2265 = vmatpush1.bf16.msra.mxu1 %v2584_v33  ;;  %v2688_v34 = vld [vmem:[#allocation2 + $0x338] ss:$0 sps:$4 sm:$0x33]  }
 0x17e   : > { %2308 = vmatpush1.bf16.msra.mxu0 %v2686_v48  ;;  %2266 = vmatprep.subr.bf16.mxu1 %v2594_v45  ;;  %v1548_v60 = vld [vmem:[#allocation2 + $0x330] sm:$0x33]  ;;  %v2121_v49 = vsel %vm270_vm0, %v2688_v34, 0 }
 0x17f   : > { %v2603_v11 = vcombine.high %v1548_v60, %v1548_v60  ;;  %2309 = vmatprep.subr.bf16.mxu0 %v3979_v8  ;;  %v2602_v10 = vcombine.low %v1548_v60, %v1548_v60 }
 0x181   : > { %2267 = vmatpush1.bf16.msra.mxu1 %v2593_v26  ;;  %v2115_v29 = vsel %vm270_vm0, %v2602_v10, 0 }
 0x182   : > { %2611 = vmatprep.subr.msk.bf16.mxu1 %vm270_vm0, %v2603_v11  ;;  %2310 = vmatpush1.bf16.msra.mxu0 %v2121_v49  ;;  %v1554_v63 = vpop.permute.xlu0 %1553 }
 0x185   : > { %2269 = vmatpush1.bf16.msra.mxu1 %v2115_v29  ;;  %2320 = vmatmul.mubr.bf16.vlgmr.msra.gmra.mrb[8].mxu0 %v3395_v57 }
 0x188   : > { %2279 = vmatmul.mubr.bf16.vlgmr.msra.gmra.mrb[4].mxu1 %v3395_v57 }
 0x1c8   : > { %v2157_v19 = vpop.f32.mrb[0].mxu0 }
 0x1c9   : > { %v2158_v55 = vadd.f32 %v2157_v19, %v1554_v63  ;;  %v2159_v52 = vpop.f32.mrb[1].mxu0 }
 0x1ca   : > { %v2160_v8 = vadd.f32 %v2159_v52, %v1554_v63  ;;  %v2161_v14 = vpop.f32.mrb[2].mxu0 }
 0x1cb   : > { %vm2327_vm1 = vcmp.gt.f32.partialorder %v2158_v55, 0.0  ;;  %v2336_v58 = vmul.f32 0.2, %v2158_v55  ;;  %v2162_v38 = vpop.f32.mrb[3].mxu0 }
 0x1cc   : > { %vm2328_vm2 = vcmp.gt.f32.partialorder %v2160_v8, 0.0  ;;  %v2337_v27 = vmul.f32 0.2, %v2160_v8 }
 0x1cd   : > { %v2345_v50 = vsel %vm2327_vm1, %v2158_v55, %v2336_v58 }
 0x1ce   : > { %v2346_v57 = vsel %vm2328_vm2, %v2160_v8, %v2337_v27 }
 0x1cf   : > { %v2621_v9 = vpack.c.bf16 %v2346_v57, %v2345_v50 }
 0x1d1   : > { %2391 = vst [vmem:[%s3914_s8] sm:$0xff] %v2621_v9 }
 0x227   : > { %v2198_v5 = vpop.f32.mrb[0].mxu1 }
 0x228   : > { %v2199_v56 = vadd.f32 %v2198_v5, %v1554_v63  ;;  %v2200_v54 = vpop.f32.mrb[1].mxu1  ;;  %v2239_v22 = vpop.f32.mrb[4].mxu0 }
 0x229   : > { %v2201_v41 = vadd.f32 %v2200_v54, %v1554_v63  ;;  %v2240_v31 = vadd.f32 %v2239_v22, %v1554_v63  ;;  %v2202_v42 = vpop.f32.mrb[2].mxu1  ;;  %v2241_v21 = vpop.f32.mrb[5].mxu0 }
 0x22a   : > { %vm2329_vm0 = vcmp.gt.f32.partialorder %v2199_v56, 0.0  ;;  %v2338_v59 = vmul.f32 0.2, %v2199_v56  ;;  %v2242_v35 = vadd.f32 %v2241_v21, %v1554_v63  ;;  %v2203_v44 = vpop.f32.mrb[3].mxu1  ;;  %v2243_v6 = vpop.f32.mrb[6].mxu0 }
 0x22b   : > { %vm2330_vm3 = vcmp.gt.f32.partialorder %v2201_v41, 0.0  ;;  %v2339_v47 = vmul.f32 0.2, %v2201_v41  ;;  %vm2331_vm4 = vcmp.gt.f32.partialorder %v2240_v31, 0.0  ;;  %v2340_v0 = vmul.f32 0.2, %v2240_v31 }
 0x22c   : > { %v2347_v1 = vsel %vm2329_vm0, %v2199_v56, %v2338_v59  ;;  %vm2332_vm5 = vcmp.gt.f32.partialorder %v2242_v35, 0.0  ;;  %v2341_v37 = vmul.f32 0.2, %v2242_v35  ;;  %v2244_v39 = vpop.f32.mrb[7].mxu0 }
 0x22d   : > { %v2348_v7 = vsel %vm2330_vm3, %v2201_v41, %v2339_v47  ;;  %v2349_v62 = vsel %vm2331_vm4, %v2240_v31, %v2340_v0 }
 0x22e   : > { %v2622_v53 = vpack.c.bf16 %v2348_v7, %v2347_v1  ;;  %v2350_v30 = vsel %vm2332_vm5, %v2242_v35, %v2341_v37 }
 0x22f   : > { %v2623_v28 = vpack.c.bf16 %v2350_v30, %v2349_v62 }
 0x230   : > { %2392 = vst [vmem:[%s3914_s8 + $0x8] sm:$0xff] %v2622_v53 }
 0x231   : > { %2393 = vst [vmem:[%s3914_s8 + $0x10] sm:$0xff] %v2623_v28 }
 0x258   : > { %v2321_v13 = vpop.f32.mrb[8].mxu0 }
 0x259   : > { %v2322_v25 = vadd.f32 %v2321_v13, %v1554_v63  ;;  %v2323_v12 = vpop.f32.mrb[9].mxu0 }
 0x25a   : > { %v2324_v20 = vpop.f32.mrb[10].mxu0 }
 0x25b   : > { %vm2335_vm6 = vcmp.gt.f32.partialorder %v2322_v25, 0.0  ;;  %v2344_v2 = vmul.f32 0.2, %v2322_v25  ;;  %v2280_v61 = vpop.f32.mrb[4].mxu1  ;;  %v2325_v51 = vpop.f32.mrb[11].mxu0 }
 0x25c   : > { %v2281_v4 = vadd.f32 %v2280_v61, %v1554_v63  ;;  %v2282_v32 = vpop.f32.mrb[5].mxu1 }
 0x25d   : > { %v2353_v15 = vsel %vm2335_vm6, %v2322_v25, %v2344_v2  ;;  %v2283_v16 = vadd.f32 %v2282_v32, %v1554_v63  ;;  %v2284_v40 = vpop.f32.mrb[6].mxu1 }
 0x25e   : > { %v2625_v3 = vpack.c.bf16 %v2353_v15, %v2353_v15  ;;  %vm2333_vm7 = vcmp.gt.f32.partialorder %v2281_v4, 0.0  ;;  %v2342_v43 = vmul.f32 0.2, %v2281_v4  ;;  %v2285_v24 = vpop.f32.mrb[7].mxu1 }
 0x25f   : > { %vm2334_vm8 = vcmp.gt.f32.partialorder %v2283_v16, 0.0  ;;  %v2343_v18 = vmul.f32 0.2, %v2283_v16 }
 0x260   : > { %2395 = vst.msk [vmem:[%s3914_s8 + $0x20] sm:$0xf] %vm227_vm12, %v2625_v3  ;;  %v2351_v23 = vsel %vm2333_vm7, %v2281_v4, %v2342_v43 }
 0x261   : > { %v2352_v46 = vsel %vm2334_vm8, %v2283_v16, %v2343_v18 }
 0x262   : > { %v2624_v36 = vpack.c.bf16 %v2352_v46, %v2351_v23 }
 0x264   : > { %2394 = vst [vmem:[%s3914_s8 + $0x18] sm:$0xff] %v2624_v36 }
 0x265 PF: > { %s13_s14 = sadd.s32 1, %s2712_s14   ;;  %s3986_s12 = smov %s2708_s13 }
 0x266   : > { %p10_p5 = scmp.ge.s32.totalorder %s13_s14, 4   ;;  %s3987_s13 = smov %s3989_s15 }
 0x268   :  { %12 = sbr.rel (!%p10_p5) target bundleno = 2 (0x2), region = 62 }

</bundles_post_ra>
